<compile_context>
chip_gen: v7x
topology: tpu7x:2x2x1
jax: 0.10.0
libtpu: 0.0.40
codegen_flags: <defaults>
</compile_context>

<pallas_src>
import jax
import jax.numpy as jnp
from jax.experimental import pallas as pl
from jax.experimental.pallas import tpu as pltpu


def ca_block_kernel(x_ref, w1_ref, wh_ref, ww_ref, pmat_ref, eh_ref, ew_ref,
                    o_ref):
    nb, c, hw = x_ref.shape
    s = pmat_ref.shape[1]          # H + W
    h = eh_ref.shape[0]
    w = ew_ref.shape[0]
    cr = w1_ref.shape[0]

    x = x_ref[...].astype(jnp.float32)          # (Nb, C, H*W), lane-dense
    w1 = w1_ref[...].astype(jnp.float32)        # (Cr, C)   conv_1x1 weight
    wh = wh_ref[...].astype(jnp.float32)        # (C, Cr)   F_h weight
    ww = ww_ref[...].astype(jnp.float32)        # (C, Cr)   F_w weight
    pmat = pmat_ref[...]                        # (H*W, H+W) mean-pooling matrix
    eh = eh_ref[...]                            # (H, H*W)   one-hot expand (h)
    ew = ew_ref[...]                            # (W, H*W)   one-hot expand (w)

    # Coordinate pooling as a single MXU matmul on the flat layout:
    # pooled[:, :, :H] = mean over W,  pooled[:, :, H:] = mean over H.
    pooled = jnp.dot(x.reshape(nb * c, hw), pmat,
                     preferred_element_type=jnp.float32).reshape(nb, c, s)

    # Shared 1x1 conv + ReLU on the concatenated (h | w) strip, batched over Nb.
    w1_b = jnp.broadcast_to(w1, (nb, cr, c))
    feat = jnp.maximum(
        jnp.einsum('nrc,ncs->nrs', w1_b, pooled,
                   preferred_element_type=jnp.float32), 0.0)    # (Nb, Cr, H+W)
    feat_h = feat[:, :, :h]                                     # (Nb, Cr, H)
    feat_w = feat[:, :, h:]                                     # (Nb, Cr, W)

    # Per-direction 1x1 convs + sigmoid gates (tiny, batched over Nb).
    wh_b = jnp.broadcast_to(wh, (nb, c, cr))
    ww_b = jnp.broadcast_to(ww, (nb, c, cr))
    s_h = jax.nn.sigmoid(jnp.einsum('ncr,nrh->nch', wh_b, feat_h,
                                    preferred_element_type=jnp.float32))
    s_w = jax.nn.sigmoid(jnp.einsum('ncr,nrw->ncw', ww_b, feat_w,
                                    preferred_element_type=jnp.float32))

    # Expand the tiny gates to the lane-dense (Nb, C, H*W) layout with one-hot
    # MXU matmuls (exact: one nonzero per column), then apply the gating.
    gate_h = jnp.dot(s_h.reshape(nb * c, h), eh,
                     preferred_element_type=jnp.float32).reshape(nb, c, hw)
    gate_w = jnp.dot(s_w.reshape(nb * c, w), ew,
                     preferred_element_type=jnp.float32).reshape(nb, c, hw)

    o_ref[...] = (x * gate_h * gate_w).astype(o_ref.dtype)


def _pooling_matrix(h, w):
    """(H*W, H+W): first H cols average over W, last W cols average over H."""
    hw = h * w
    k = jnp.arange(hw)
    ph = jnp.equal((k // w)[:, None],
                   jnp.arange(h)[None, :]).astype(jnp.float32) * (1.0 / w)
    pw = jnp.equal((k % w)[:, None],
                   jnp.arange(w)[None, :]).astype(jnp.float32) * (1.0 / h)
    return jnp.concatenate([ph, pw], axis=1)


def _expand_matrices(h, w):
    """One-hot matrices broadcasting (.,H)->(.,H*W) and (.,W)->(.,H*W)."""
    hw = h * w
    k = jnp.arange(hw)
    eh = jnp.equal(jnp.arange(h)[:, None], (k // w)[None, :]).astype(jnp.float32)
    ew = jnp.equal(jnp.arange(w)[:, None], (k % w)[None, :]).astype(jnp.float32)
    return eh, ew


def _choose_block_n(n, bytes_per_sample):
    # Target ~2 MiB of x per grid step; with the output tile and double
    # buffering that is ~8 MiB live VMEM, comfortably inside v7x's 64 MiB
    # (32 MiB scoped default) and tiny relative to v5e/v6e's 128 MiB.
    target = 2 * 1024 * 1024
    nb = max(1, min(n, target // max(bytes_per_sample, 1)))
    # Keep at least 2 grid steps when possible so both v7x TensorCores get work.
    if n >= 2:
        nb = min(nb, -(-n // 2))
    return int(nb)


def ca_block(x, w1, wh, ww, *, block_n=None):
    """x: (N, C, H, W); w1: (Cr, C); wh, ww: (C, Cr)."""
    n, c, h, w = x.shape
    cr = w1.shape[0]
    hw = h * w

    x_flat = x.reshape(n, c, hw)       # free reshape: NCHW is (H,W)-contiguous
    if block_n is None:
        block_n = _choose_block_n(n, c * hw * x.dtype.itemsize)
    grid_n = -(-n // block_n)

    pmat = _pooling_matrix(h, w)
    eh, ew = _expand_matrices(h, w)

    out_flat = pl.pallas_call(
        ca_block_kernel,
        out_shape=jax.ShapeDtypeStruct((n, c, hw), x.dtype),
        grid_spec=pltpu.PrefetchScalarGridSpec(
            num_scalar_prefetch=0,
            grid=(grid_n,),
            in_specs=[
                pl.BlockSpec((block_n, c, hw), lambda i: (i, 0, 0)),
                pl.BlockSpec((cr, c), lambda i: (0, 0)),
                pl.BlockSpec((c, cr), lambda i: (0, 0)),
                pl.BlockSpec((c, cr), lambda i: (0, 0)),
                pl.BlockSpec((hw, h + w), lambda i: (0, 0)),
                pl.BlockSpec((h, hw), lambda i: (0, 0)),
                pl.BlockSpec((w, hw), lambda i: (0, 0)),
            ],
            out_specs=pl.BlockSpec((block_n, c, hw), lambda i: (i, 0, 0)),
        ),
        compiler_params=pltpu.CompilerParams(
            dimension_semantics=("parallel",)),
    )(x_flat, w1, wh, ww, pmat, eh, ew)
    return out_flat.reshape(n, c, h, w)


def ca_block_ref(x, w1, wh, ww):
    """Pure-JAX reference mirroring the PyTorch forward."""
    xf = x.astype(jnp.float32)
    pool_w = jnp.mean(xf, axis=3)                        # (N, C, H)
    pool_h = jnp.mean(xf, axis=2)                        # (N, C, W)
    feat_h = jax.nn.relu(jnp.einsum('rc,nch->nrh', w1, pool_w))
    feat_w = jax.nn.relu(jnp.einsum('rc,ncw->nrw', w1, pool_h))
    s_h = jax.nn.sigmoid(jnp.einsum('cr,nrh->nch', wh, feat_h))  # (N, C, H)
    s_w = jax.nn.sigmoid(jnp.einsum('cr,nrw->ncw', ww, feat_w))  # (N, C, W)
    out = xf * s_h[:, :, :, None] * s_w[:, :, None, :]
    return out.astype(x.dtype)


if __name__ == "__main__":
    # Small shapes consistent with the module: channel=32, reduction=4 -> Cr=8
    N, C, H, W = 8, 32, 16, 16
    reduction = 4
    Cr = C // reduction

    key = jax.random.PRNGKey(0)
    kx, k1, kh, kw = jax.random.split(key, 4)
    x = jax.random.normal(kx, (N, C, H, W), dtype=jnp.float32)
    # Deterministic synthetic weights (1x1 convs, bias=False), ~kaiming scale
    w1 = jax.random.normal(k1, (Cr, C), dtype=jnp.float32) * (1.0 / C) ** 0.5
    wh = jax.random.normal(kh, (C, Cr), dtype=jnp.float32) * (1.0 / Cr) ** 0.5
    ww = jax.random.normal(kw, (C, Cr), dtype=jnp.float32) * (1.0 / Cr) ** 0.5

    out = jax.block_until_ready(ca_block(x, w1, wh, ww))
    ref = jax.block_until_ready(ca_block_ref(x, w1, wh, ww))

    if not jnp.allclose(out, ref, atol=1e-4, rtol=1e-4):
        raise AssertionError("Pallas CA_Block output does not match reference")
    print("KERNEL_OK")
</pallas_src>

<mosaic_0001>
module attributes {stable_mosaic.version = 11 : i64} {
  func.func @ca_block_kernel(%arg0: i32, %arg1: memref<4x32x256xf32, #tpu.memory_space<vmem>>, %arg2: memref<8x32xf32, #tpu.memory_space<vmem>>, %arg3: memref<32x8xf32, #tpu.memory_space<vmem>>, %arg4: memref<32x8xf32, #tpu.memory_space<vmem>>, %arg5: memref<256x32xf32, #tpu.memory_space<vmem>>, %arg6: memref<16x256xf32, #tpu.memory_space<vmem>>, %arg7: memref<16x256xf32, #tpu.memory_space<vmem>>, %arg8: memref<4x32x256xf32, #tpu.memory_space<vmem>>) attributes {dimension_semantics = [#tpu.dimension_semantics<parallel>], iteration_bounds = array<i64: 2>, scalar_prefetch = 0 : i64, scratch_operands = 0 : i64, tpu.core_type = #tpu.core_type<tc>, window_params = [{transform_indices = @transform_0, window_bounds = array<i64: 4, 32, 256>}, {pipeline_mode = #tpu.pipeline_mode<synchronous>, transform_indices = @transform_1, window_bounds = array<i64: 8, 32>}, {pipeline_mode = #tpu.pipeline_mode<synchronous>, transform_indices = @transform_2, window_bounds = array<i64: 32, 8>}, {pipeline_mode = #tpu.pipeline_mode<synchronous>, transform_indices = @transform_3, window_bounds = array<i64: 32, 8>}, {pipeline_mode = #tpu.pipeline_mode<synchronous>, transform_indices = @transform_4, window_bounds = array<i64: 256, 32>}, {pipeline_mode = #tpu.pipeline_mode<synchronous>, transform_indices = @transform_5, window_bounds = array<i64: 16, 256>}, {pipeline_mode = #tpu.pipeline_mode<synchronous>, transform_indices = @transform_6, window_bounds = array<i64: 16, 256>}, {transform_indices = @transform_7, window_bounds = array<i64: 4, 32, 256>}]} {
    %c0 = arith.constant 0 : index
    %c0_0 = arith.constant 0 : index
    %c0_1 = arith.constant 0 : index
    %0 = vector.load %arg1[%c0, %c0_0, %c0_1] : memref<4x32x256xf32, #tpu.memory_space<vmem>>, vector<4x32x256xf32>
    %c0_2 = arith.constant 0 : index
    %c0_3 = arith.constant 0 : index
    %1 = vector.load %arg2[%c0_2, %c0_3] : memref<8x32xf32, #tpu.memory_space<vmem>>, vector<8x32xf32>
    %c0_4 = arith.constant 0 : index
    %c0_5 = arith.constant 0 : index
    %2 = vector.load %arg3[%c0_4, %c0_5] : memref<32x8xf32, #tpu.memory_space<vmem>>, vector<32x8xf32>
    %c0_6 = arith.constant 0 : index
    %c0_7 = arith.constant 0 : index
    %3 = vector.load %arg4[%c0_6, %c0_7] : memref<32x8xf32, #tpu.memory_space<vmem>>, vector<32x8xf32>
    %c0_8 = arith.constant 0 : index
    %c0_9 = arith.constant 0 : index
    %4 = vector.load %arg5[%c0_8, %c0_9] : memref<256x32xf32, #tpu.memory_space<vmem>>, vector<256x32xf32>
    %c0_10 = arith.constant 0 : index
    %c0_11 = arith.constant 0 : index
    %5 = vector.load %arg6[%c0_10, %c0_11] : memref<16x256xf32, #tpu.memory_space<vmem>>, vector<16x256xf32>
    %c0_12 = arith.constant 0 : index
    %c0_13 = arith.constant 0 : index
    %6 = vector.load %arg7[%c0_12, %c0_13] : memref<16x256xf32, #tpu.memory_space<vmem>>, vector<16x256xf32>
    %7 = vector.shape_cast %0 : vector<4x32x256xf32> to vector<128x256xf32>
    %cst = arith.constant dense<0.000000e+00> : vector<128x32xf32>
    %8 = tpu.matmul %7, %4, %cst {dimension_numbers = #tpu.dot_dimension_numbers<[1], [0], [0], [1], [0, 0, 1, 1], [], []>} : vector<128x256xf32>, vector<256x32xf32>, vector<128x32xf32> -> vector<128x32xf32>
    %9 = vector.shape_cast %8 : vector<128x32xf32> to vector<4x32x32xf32>
    %10 = vector.shape_cast %1 : vector<8x32xf32> to vector<1x8x32xf32>
    %11 = vector.broadcast %10 : vector<1x8x32xf32> to vector<4x8x32xf32>
    "tpu.trace_start"() <{level = 10 : i32, message = "nrc,ncs->nrs"}> : () -> ()
    %cst_14 = arith.constant dense<0.000000e+00> : vector<4x8x32xf32>
    %12 = tpu.matmul %11, %9, %cst_14 {dimension_numbers = #tpu.dot_dimension_numbers<[2], [1], [1], [2], [0, 0, 0, 1, 1, 2], [0], [0]>} : vector<4x8x32xf32>, vector<4x32x32xf32>, vector<4x8x32xf32> -> vector<4x8x32xf32>
    "tpu.trace_stop"() : () -> ()
    %cst_15 = arith.constant 0.000000e+00 : f32
    %13 = vector.broadcast %cst_15 : f32 to vector<4x8x32xf32>
    %14 = arith.maximumf %12, %13 : vector<4x8x32xf32>
    %15 = vector.extract_strided_slice %14 {offsets = [0, 0, 0], sizes = [4, 8, 16], strides = [1, 1, 1]} : vector<4x8x32xf32> to vector<4x8x16xf32>
    %16 = vector.extract_strided_slice %14 {offsets = [0, 0, 16], sizes = [4, 8, 16], strides = [1, 1, 1]} : vector<4x8x32xf32> to vector<4x8x16xf32>
    %17 = vector.shape_cast %2 : vector<32x8xf32> to vector<1x32x8xf32>
    %18 = vector.broadcast %17 : vector<1x32x8xf32> to vector<4x32x8xf32>
    %19 = vector.shape_cast %3 : vector<32x8xf32> to vector<1x32x8xf32>
    %20 = vector.broadcast %19 : vector<1x32x8xf32> to vector<4x32x8xf32>
    "tpu.trace_start"() <{level = 10 : i32, message = "ncr,nrh->nch"}> : () -> ()
    %cst_16 = arith.constant dense<0.000000e+00> : vector<4x32x16xf32>
    %21 = tpu.matmul %18, %15, %cst_16 {dimension_numbers = #tpu.dot_dimension_numbers<[2], [1], [1], [2], [0, 0, 0, 1, 1, 2], [0], [0]>} : vector<4x32x8xf32>, vector<4x8x16xf32>, vector<4x32x16xf32> -> vector<4x32x16xf32>
    "tpu.trace_stop"() : () -> ()
    %22 = arith.negf %21 : vector<4x32x16xf32>
    %23 = math.exp %22 : vector<4x32x16xf32>
    %cst_17 = arith.constant 1.000000e+00 : f32
    %24 = vector.broadcast %cst_17 : f32 to vector<4x32x16xf32>
    %25 = arith.addf %24, %23 : vector<4x32x16xf32>
    %26 = arith.divf %24, %25 : vector<4x32x16xf32>
    "tpu.trace_start"() <{level = 10 : i32, message = "ncr,nrw->ncw"}> : () -> ()
    %cst_18 = arith.constant dense<0.000000e+00> : vector<4x32x16xf32>
    %27 = tpu.matmul %20, %16, %cst_18 {dimension_numbers = #tpu.dot_dimension_numbers<[2], [1], [1], [2], [0, 0, 0, 1, 1, 2], [0], [0]>} : vector<4x32x8xf32>, vector<4x8x16xf32>, vector<4x32x16xf32> -> vector<4x32x16xf32>
    "tpu.trace_stop"() : () -> ()
    %28 = arith.negf %27 : vector<4x32x16xf32>
    %29 = math.exp %28 : vector<4x32x16xf32>
    %cst_19 = arith.constant 1.000000e+00 : f32
    %30 = vector.broadcast %cst_19 : f32 to vector<4x32x16xf32>
    %31 = arith.addf %30, %29 : vector<4x32x16xf32>
    %32 = arith.divf %30, %31 : vector<4x32x16xf32>
    %33 = vector.shape_cast %26 : vector<4x32x16xf32> to vector<128x16xf32>
    %cst_20 = arith.constant dense<0.000000e+00> : vector<128x256xf32>
    %34 = tpu.matmul %33, %5, %cst_20 {dimension_numbers = #tpu.dot_dimension_numbers<[1], [0], [0], [1], [0, 0, 1, 1], [], []>} : vector<128x16xf32>, vector<16x256xf32>, vector<128x256xf32> -> vector<128x256xf32>
    %35 = vector.shape_cast %34 : vector<128x256xf32> to vector<4x32x256xf32>
    %36 = vector.shape_cast %32 : vector<4x32x16xf32> to vector<128x16xf32>
    %cst_21 = arith.constant dense<0.000000e+00> : vector<128x256xf32>
    %37 = tpu.matmul %36, %6, %cst_21 {dimension_numbers = #tpu.dot_dimension_numbers<[1], [0], [0], [1], [0, 0, 1, 1], [], []>} : vector<128x16xf32>, vector<16x256xf32>, vector<128x256xf32> -> vector<128x256xf32>
    %38 = vector.shape_cast %37 : vector<128x256xf32> to vector<4x32x256xf32>
    %39 = arith.mulf %0, %35 : vector<4x32x256xf32>
    %40 = arith.mulf %39, %38 : vector<4x32x256xf32>
    %c0_22 = arith.constant 0 : index
    %c0_23 = arith.constant 0 : index
    %c0_24 = arith.constant 0 : index
    %41 = vector.load %arg8[%c0_22, %c0_23, %c0_24] : memref<4x32x256xf32, #tpu.memory_space<vmem>>, vector<4x32x256xf32>
    tpu.vector_store %arg8[%c0_22, %c0_23, %c0_24], %40 {strides = array<i32>} : memref<4x32x256xf32, #tpu.memory_space<vmem>>, vector<4x32x256xf32>,
    return
  }
  func.func @transform_0(%arg0: i32) -> (i32, i32, i32) {
    %c0_i32 = arith.constant 0 : i32
    %c0_i32_0 = arith.constant 0 : i32
    %c0_i32_1 = arith.constant 0 : i32
    return %arg0, %c0_i32, %c0_i32_0 : i32, i32, i32
  }
  func.func @transform_1(%arg0: i32) -> (i32, i32) {
    %c0_i32 = arith.constant 0 : i32
    %c0_i32_0 = arith.constant 0 : i32
    %c0_i32_1 = arith.constant 0 : i32
    return %c0_i32, %c0_i32_0 : i32, i32
  }
  func.func @transform_2(%arg0: i32) -> (i32, i32) {
    %c0_i32 = arith.constant 0 : i32
    %c0_i32_0 = arith.constant 0 : i32
    %c0_i32_1 = arith.constant 0 : i32
    return %c0_i32, %c0_i32_0 : i32, i32
  }
  func.func @transform_3(%arg0: i32) -> (i32, i32) {
    %c0_i32 = arith.constant 0 : i32
    %c0_i32_0 = arith.constant 0 : i32
    %c0_i32_1 = arith.constant 0 : i32
    return %c0_i32, %c0_i32_0 : i32, i32
  }
  func.func @transform_4(%arg0: i32) -> (i32, i32) {
    %c0_i32 = arith.constant 0 : i32
    %c0_i32_0 = arith.constant 0 : i32
    %c0_i32_1 = arith.constant 0 : i32
    return %c0_i32, %c0_i32_0 : i32, i32
  }
  func.func @transform_5(%arg0: i32) -> (i32, i32) {
    %c0_i32 = arith.constant 0 : i32
    %c0_i32_0 = arith.constant 0 : i32
    %c0_i32_1 = arith.constant 0 : i32
    return %c0_i32, %c0_i32_0 : i32, i32
  }
  func.func @transform_6(%arg0: i32) -> (i32, i32) {
    %c0_i32 = arith.constant 0 : i32
    %c0_i32_0 = arith.constant 0 : i32
    %c0_i32_1 = arith.constant 0 : i32
    return %c0_i32, %c0_i32_0 : i32, i32
  }
  func.func @transform_7(%arg0: i32) -> (i32, i32, i32) {
    %c0_i32 = arith.constant 0 : i32
    %c0_i32_0 = arith.constant 0 : i32
    %c0_i32_1 = arith.constant 0 : i32
    return %arg0, %c0_i32, %c0_i32_0 : i32, i32, i32
  }
}

</mosaic_0001>

<bundles_post_ra>
// kernel: tpu_custom_call.1
= control target key start
LH: loop header
LB: loop body
LE: loop exit
PB: predicated region body
PF: predicated region fallthrough
CT: control target
= control target key end

     0   :  { %12 = vsyncpa [#allocation3], 0  ;;  %s3730_s0 = inlined_call_operand.hbm [shape: f32[8,32,256], index: 0, kind: input, shape index: {}]   ;;  %s3731_s1 = inlined_call_operand.vmem [shape: f32[8,32], index: 1, kind: input, shape index: {}]   ;;  %s3732_s2 = inlined_call_operand.vmem [shape: f32[32,8], index: 2, kind: input, shape index: {}]   ;;  %s3733_s3 = inlined_call_operand.vmem [shape: f32[32,8], index: 3, kind: input, shape index: {}]   ;;  %s3734_s4 = inlined_call_operand.vmem [shape: f32[256,32], index: 4, kind: input, shape index: {}]   ;;  %s3735_s5 = inlined_call_operand.vmem [shape: f32[16,256], index: 5, kind: input, shape index: {}]   ;;  %s3736_s6 = inlined_call_operand.vmem [shape: f32[16,256], index: 6, kind: input, shape index: {}]   ;;  %s3737_s7 = inlined_call_operand.hbm [shape: f32[8,32,256], index: 7, kind: output, shape index: {}]  }
   0x1   :  { %14 = vsyncpa [#allocation3 + $0x1], 0 }
   0x2   :  { %15 = vsyncpa [#allocation4], 0 }
   0x3   :  { %17 = vsyncpa [#allocation4 + $0x1], 0  ;;  %s3124_s24 = smov 0   ;;  %s3126_s25 = smov 0  }
   0x4   :  { %s3128_s26 = smov 0   ;;  %s3130_s27 = smov 0  }
   0x5 LB: > { %s3145_s28 = sadd.s32 4294967295, %s3072_s27   ;;  %s2330_s29 = sadd.s32 4294967294, %s3072_s27   ;;  %s3072_s27 = sphi %s3130_s27, %s3750_s27   ;;  %s3068_s26 = sphi %s3128_s26, %s3749_s26   ;;  %s3064_s25 = sphi %s3126_s25, %s3748_s25   ;;  %s3060_s24 = sphi %s3124_s24, %s3747_s24  }
   0x6   : > { %s3149_s30 = sadd.s32 1, %s3072_s27   ;;  %s30_s8 = sadd.s32 1, %s3068_s26 }
   0x7   : > { %s27_s9 = ssub.s32 %s3072_s27, %s3149_s30  ;;  %p37_p0 = scmp.ne.s32.totalorder %s3068_s26, %s3064_s25 }
   0x8   : > { %p28_p1 = scmp.eq.s32.totalorder %s27_s9, 0  ;;  %p38_p2 = scmp.eq.s32.totalorder %s3072_s27, 0 }
   0x9   : > { %p43_p3 = scmp.ne.s32.totalorder %s3064_s25, %s3060_s24  ;;  %p44_p4 = scmp.eq.s32.totalorder %s3145_s28, 0 }
   0xa   : > { %s3161_s10 = scalar_select %p28_p1, %s3068_s26, %s30_s8  }
   0xb   : > { %p3163_p5 = por %p38_p2, %p37_p0  ;;  %p3167_p6 = por %p44_p4, %p43_p3 }
   0xc   : > { %p193_p7 = scmp.eq.s32.totalorder %s3145_s28, 1  ;;  %p199_p8 = scmp.eq.s32.totalorder %s2330_s29, 1 }
   0xd   : > { %p2774_p10 = scmp.lt.s32.totalorder %s3072_s27, 2  ;;  %s237_s15 = sand.u32 1, %s3068_s26  }
   0xe   : > { %p3174_p11 = por %p193_p7, %p37_p0  ;;  %p3178_p12 = por %p199_p8, %p43_p3 }
   0xf   : > { %s2447_s16 = sshll.u32 %s3072_s27, 12  ;;  %s2333_s17 = sshll.u32 %s237_s15, 8 }
  0x10   : > { %s3741_s13 = scalar_select %p3174_p11, 1, 0 }
  0x11   : > { %s3742_s14 = scalar_select %p3178_p12, 1, 0 }
  0x12   : > { %s3187_s20 = scalar_lea.hbm %s3730_s0, %s2447_s16  ;;  %s241_s21 = scalar_lea.vmem [#allocation2], %s2333_s17 }
  0x13   : > { %s249_s22 = sshll.u32 %s241_s21, 4  ;;  %p3191_p13 = pnand %p2774_p10, %p3163_p5  ;;  %s3195_s22 = int_to_ptr.vmem [resolvable:$true] %s249_s22 }
  0x14   : > { %s3197_s29 = scalar_lea.sflag [#allocation3], %s237_s15  ;;  %s2976_s8 = scalar_lea.hbm %s3187_s20, 4096 }
  0x15   : > { %p2977_p0 = scmp.ne.s32.totalorder %s3187_s20, %s2976_s8  ;;  %p2978_p1 = pneg %p3191_p13 }
  0x16   : > { %s2981_s16 = scalar_lea.hbm %s3730_s0, 8192  ;;  %p2982_p4 = scmp.lt.u32.totalorder %s3187_s20, %s3730_s0 }
  0x17   : > { %p2979_p2 = pnand %p2978_p1, %p2977_p0  ;;  %p2983_p5 = scmp.lt.u32.totalorder %s2981_s16, %s2976_s8 }
  0x18   : > { %p2985_p8 = scmp.lt.u32.totalorder %s2976_s8, %s3187_s20 }
  0x19   : > { %p2980_p3 = pneg %p2979_p2  ;;  %p2984_p7 = por %p2983_p5, %p2982_p4 }
  0x1b   : > { %p2986_p10 = por %p2985_p8, %p2984_p7 }
  0x1d   : > { %p2987_p9 = pnand %p2986_p10, %p2980_p3 }
  0x1f   : > { %2990 = shalt.err (!%p2987_p9)
}
  0x20   : > { %s2991_s15 = scalar_lea.vmem %s3195_s22, 4096  ;;  %s3074_s19 = smov [#allocation2]  }
  0x21   : > { %p2992_p0 = scmp.ne.s32.totalorder %s3195_s22, %s2991_s15  ;;  %s2996_s21 = sshll.u32 %s3074_s19, 4  ;;  %s2997_s21 = int_to_ptr.vmem [resolvable:$false] %s2996_s21 }
  0x22   : > { %s2998_s9 = scalar_lea.vmem %s2997_s21, 8192  ;;  %p2999_p11 = scmp.lt.s32.totalorder %s3195_s22, %s2997_s21 }
  0x23   : > { %p2994_p2 = pnand %p2992_p0, %p2978_p1  ;;  %p3000_p4 = scmp.lt.s32.totalorder %s2998_s9, %s2991_s15 }
  0x25   : > { %p2995_p12 = pneg %p2994_p2  ;;  %p3001_p5 = por %p3000_p4, %p2999_p11 }
  0x27   : > { %p3002_p7 = pnand %p3001_p5, %p2995_p12 }
  0x29   : > { %3005 = shalt.err (!%p3002_p7)
}
  0x2a   : > { %s3075_s8 = smov 256   ;;  %s3076_s11 = smov 16  }
  0x2b   : > { %2769 = dma.hbm_to_vmem [thread:$0]  (!%p3191_p13), %s3187_s20, 4096, %s3195_s22, %s3197_s29, %s3075_s8, %s3075_s8, %s3076_s11  }
  0x2c   : > { %p2337_p9 = scmp.ge.s32.totalorder %s3072_s27, 1  ;;  %p257_p1 = scmp.lt.s32.totalorder %s3072_s27, 3 }
  0x2e   : > { %p258_p3 = pnand %p2337_p9, %p257_p1 }
  0x2f   : > { %s3228_s16 = sand.u32 (!%p258_p3), 1, %s3064_s25  }
  0x30   : > { %261 = sbr.rel (%p258_p3) target bundleno = 1184 (0x4a0), region = 48  ;;  %s2338_s17 = sshll.u32 (!%p258_p3), %s3228_s16, 8 }
  0x31   : > { %s264_s18 = scalar_lea.sflag (!%p258_p3), [#allocation3], %s3228_s16  ;;  %s3234_s15 = scalar_lea.vmem (!%p258_p3), [#allocation2], %s2338_s17 }
  0x37   : > { %3051 = dma.done.wait (%p3167_p6), %s264_s18, 4096  }
  0x38   : > { %3053 = vsyncadd (%p3167_p6), %s264_s18, 4294963200  ;;  %v357_v0 = vld [vmem:[%s3734_s4 + $0x80] sm:$0xff]  ;;  %v358_v1 = vld [vmem:[%s3734_s4 + $0x88] sm:$0xff]  ;;  %vm3078_vm0 = vmmov 0   ;;  %vm526_vm1 = vcmask 261120   ;;  %vm814_vm2 = vcmask 64512  }
  0x39   : > { %v341_v2 = vld [vmem:[%s3734_s4] sm:$0xff]  ;;  %v2698_v3 = vpack.c.bf16 %v358_v1, %v357_v0  ;;  %v342_v4 = vld [vmem:[%s3734_s4 + $0x8] sm:$0xff]  ;;  %v359_v5 = vld [vmem:[%s3734_s4 + $0x90] sm:$0xff]  ;;  %s3080_s19 = smov 112   ;;  %vm1727_vm3 = vcmask 130048   ;;  %s3592_s20 = scalar_lea.vmem [#allocation5], %s2338_s17 }
  0x3a   : > { %v360_v6 = vld [vmem:[%s3734_s4 + $0x98] sm:$0xff]  ;;  %v2700_v7 = vpack.c.bf16 %v342_v4, %v341_v2  ;;  %v343_v9 = vld [vmem:[%s3734_s4 + $0x10] sm:$0xff]  ;;  %v361_v11 = vld [vmem:[%s3734_s4 + $0xa0] sm:$0xff]  ;;  %s2449_s17 = sshll.u32 %s3145_s28, 12  ;;  %s2257_s22 = sshll.u32 %s3592_s20, 4  ;;  %s3684_s22 = int_to_ptr.vmem [resolvable:$true] %s2257_s22 }
  0x3b   : > { %v2702_v8 = vpack.c.bf16 %v360_v6, %v359_v5  ;;  %v344_v10 = vld [vmem:[%s3734_s4 + $0x18] sm:$0xff]  ;;  %2699 = vmatprep.subr.bf16.mxu0 %v2698_v3  ;;  %v362_v12 = vld [vmem:[%s3734_s4 + $0xa8] sm:$0xff]  ;;  %v345_v15 = vld [vmem:[%s3734_s4 + $0x20] sm:$0xff]  ;;  %s2243_s28 = scalar_lea.sflag [#allocation4], %s3228_s16  ;;  %p3744_p11 = scmp.ne.s32.totalorder %s3741_s13, 0 }
  0x3c   : > { %2701 = vmatpush3.bf16.msra.mxu0 %v2700_v7  ;;  %v2704_v13 = vpack.c.bf16 %v344_v10, %v343_v9  ;;  %v2706_v14 = vpack.c.bf16 %v362_v12, %v361_v11  ;;  %v346_v16 = vld [vmem:[%s3734_s4 + $0x28] sm:$0xff]  ;;  %v363_v17 = vld [vmem:[%s3734_s4 + $0xb0] sm:$0xff]  ;;  %v364_v18 = vld [vmem:[%s3734_s4 + $0xb8] sm:$0xff]  ;;  %s3081_s21 = smov [#allocation5]  }
  0x3d   : > { %2703 = vmatprep.subr.bf16.mxu0 %v2702_v8  ;;  %v2708_v19 = vpack.c.bf16 %v346_v16, %v345_v15  ;;  %v2710_v20 = vpack.c.bf16 %v364_v18, %v363_v17  ;;  %v347_v21 = vld [vmem:[%s3734_s4 + $0x30] sm:$0xff]  ;;  %v348_v22 = vld [vmem:[%s3734_s4 + $0x38] sm:$0xff]  ;;  %v365_v23 = vld [vmem:[%s3734_s4 + $0xc0] sm:$0xff]  ;;  %v3077_v16 = vmov 0.0|0.0   ;;  %v3079_v17 = vmov 0.0   ;;  %s3010_s9 = sshll.u32 %s3081_s21, 4  ;;  %s3011_s9 = int_to_ptr.vmem [resolvable:$false] %s3010_s9 }
  0x3e   : > { %v366_v24 = vld [vmem:[%s3734_s4 + $0xc8] sm:$0xff]  ;;  %v2712_v26 = vpack.c.bf16 %v348_v22, %v347_v21  ;;  %v349_v28 = vld [vmem:[%s3734_s4 + $0x40] sm:$0xff]  ;;  %v367_v30 = vld [vmem:[%s3734_s4 + $0xd0] sm:$0xff]  ;;  %2730 = vmatprep.subr.bf16.mxu1 %v3077_v16  ;;  %2598 = vmatprep.mubr.msk.f32.mxu1 %vm3078_vm0, %v3079_v17  ;;  %s3012_s8 = scalar_lea.vmem %s3011_s9, 8192  ;;  %p3013_p8 = scmp.lt.s32.totalorder %s3684_s22, %s3011_s9 }
  0x3f   : > { %v301_v25 = vld [vmem:[%s3234_s15 + $0x8] sm:$0xff]  ;;  %v2714_v27 = vpack.c.bf16 %v366_v24, %v365_v23  ;;  %v368_v31 = vld [vmem:[%s3734_s4 + $0xd8] sm:$0xff]  ;;  %v351_v34 = vld [vmem:[%s3734_s4 + $0x50] sm:$0xff] }
  0x40   : > { %2705 = vmatpush3.bf16.msra.mxu0 %v2704_v13  ;;  %445 = vmatprep.mubr.f32.mxu0 %v301_v25  ;;  %v350_v29 = vld [vmem:[%s3734_s4 + $0x48] sm:$0xff]  ;;  %v2718_v33 = vpack.c.bf16 %v368_v31, %v367_v30  ;;  %v352_v35 = vld [vmem:[%s3734_s4 + $0x58] sm:$0xff]  ;;  %v369_v36 = vld [vmem:[%s3734_s4 + $0xe0] sm:$0xff] }
  0x41   : > { %2707 = vmatprep.subr.bf16.mxu0 %v2706_v14  ;;  %v2716_v32 = vpack.c.bf16 %v350_v29, %v349_v28  ;;  %v370_v37 = vld [vmem:[%s3734_s4 + $0xe8] sm:$0xff]  ;;  %v2720_v38 = vpack.c.bf16 %v352_v35, %v351_v34  ;;  %v353_v40 = vld [vmem:[%s3734_s4 + $0x60] sm:$0xff]  ;;  %v371_v42 = vld [vmem:[%s3734_s4 + $0xf0] sm:$0xff] }
  0x42   : > { %v2722_v39 = vpack.c.bf16 %v370_v37, %v369_v36  ;;  %v354_v41 = vld [vmem:[%s3734_s4 + $0x68] sm:$0xff]  ;;  %v372_v43 = vld [vmem:[%s3734_s4 + $0xf8] sm:$0xff]  ;;  %v355_v46 = vld [vmem:[%s3734_s4 + $0x70] sm:$0xff] }
  0x43   : > { %v2724_v44 = vpack.c.bf16 %v354_v41, %v353_v40  ;;  %v2726_v45 = vpack.c.bf16 %v372_v43, %v371_v42  ;;  %v356_v47 = vld [vmem:[%s3734_s4 + $0x78] sm:$0xff]  ;;  %v300_v49 = vld [vmem:[%s3234_s15] sm:$0xff]  ;;  %v302_v51 = vld [vmem:[%s3234_s15 + $0x10] sm:$0xff] }
  0x44   : > { %2709 = vmatpush3.bf16.msra.mxu0 %v2708_v19  ;;  %v2728_v48 = vpack.c.bf16 %v356_v47, %v355_v46  ;;  %v303_v50 = vld [vmem:[%s3234_s15 + $0x18] sm:$0xff]  ;;  %v305_v52 = vld [vmem:[%s3234_s15 + $0x28] sm:$0xff]  ;;  %v304_v53 = vld [vmem:[%s3234_s15 + $0x20] sm:$0xff] }
  0x45   : > { %2711 = vmatprep.subr.bf16.mxu0 %v2710_v20  ;;  %v307_v54 = vld [vmem:[%s3234_s15 + $0x38] sm:$0xff]  ;;  %v306_v55 = vld [vmem:[%s3234_s15 + $0x30] sm:$0xff]  ;;  %v309_v56 = vld [vmem:[%s3234_s15 + $0x48] sm:$0xff] }
  0x46   : > { %v308_v57 = vld [vmem:[%s3234_s15 + $0x40] sm:$0xff]  ;;  %v311_v58 = vld [vmem:[%s3234_s15 + $0x58] sm:$0xff]  ;;  %v310_v59 = vld [vmem:[%s3234_s15 + $0x50] sm:$0xff] }
  0x47   : > { %v313_v60 = vld [vmem:[%s3234_s15 + $0x68] sm:$0xff]  ;;  %v312_v61 = vld [vmem:[%s3234_s15 + $0x60] sm:$0xff]  ;;  %v315_v62 = vld [vmem:[%s3234_s15 + $0x78] sm:$0xff] }
  0x48   : > { %2713 = vmatpush3.bf16.msra.mxu0 %v2712_v26  ;;  %v314_v63 = vld [vmem:[%s3234_s15 + $0x70] sm:$0xff]  ;;  %v317_v0 = vld [vmem:[%s3234_s15 + $0x88] sm:$0xff]  ;;  %v316_v1 = vld [vmem:[%s3234_s15 + $0x80] sm:$0xff] }
  0x49   : > { %2715 = vmatprep.subr.bf16.mxu0 %v2714_v27  ;;  %v319_v2 = vld [vmem:[%s3234_s15 + $0x98] sm:$0xff]  ;;  %v318_v3 = vld [vmem:[%s3234_s15 + $0x90] sm:$0xff]  ;;  %v321_v4 = vld [vmem:[%s3234_s15 + $0xa8] sm:$0xff] }
  0x4a   : > { %v320_v5 = vld [vmem:[%s3234_s15 + $0xa0] sm:$0xff]  ;;  %v323_v6 = vld [vmem:[%s3234_s15 + $0xb8] sm:$0xff]  ;;  %v322_v7 = vld [vmem:[%s3234_s15 + $0xb0] sm:$0xff] }
  0x4b   : > { %v325_v8 = vld [vmem:[%s3234_s15 + $0xc8] sm:$0xff]  ;;  %v324_v9 = vld [vmem:[%s3234_s15 + $0xc0] sm:$0xff]  ;;  %v327_v10 = vld [vmem:[%s3234_s15 + $0xd8] sm:$0xff] }
  0x4c   : > { %2717 = vmatpush3.bf16.msra.mxu0 %v2716_v32  ;;  %v326_v11 = vld [vmem:[%s3234_s15 + $0xd0] sm:$0xff]  ;;  %v329_v12 = vld [vmem:[%s3234_s15 + $0xe8] sm:$0xff]  ;;  %v328_v13 = vld [vmem:[%s3234_s15 + $0xe0] sm:$0xff] }
  0x4d   : > { %2719 = vmatprep.subr.bf16.mxu0 %v2718_v33  ;;  %v331_v14 = vld [vmem:[%s3234_s15 + $0xf8] sm:$0xff]  ;;  %v330_v15 = vld [vmem:[%s3234_s15 + $0xf0] sm:$0xff]  ;;  %v332_v35 = vld [vmem:[%s3731_s1] sm:$0xff] }
  0x50   : > { %2721 = vmatpush3.bf16.msra.mxu0 %v2720_v38 }
  0x51   : > { %2723 = vmatprep.subr.bf16.mxu0 %v2722_v39 }
  0x54   : > { %2725 = vmatpush3.bf16.msra.mxu0 %v2724_v44 }
  0x55   : > { %2727 = vmatprep.subr.bf16.mxu0 %v2726_v45 }
  0x58   : > { %2729 = vmatpush3.bf16.msra.mxu0 %v2728_v48 }
  0x5b   : > { %446 = vmatmul.mubr.f32.vlgmr.msra.gmra.mrb[0].mxu0 %v300_v49 }
  0x5c   : > { %450 = vmatprep.mubr.f32.mxu0 %v303_v50 }
  0x5f   : > { %451 = vmatmul.mubr.f32.gmra.mrb[2].mxu0 %v302_v51 }
  0x60   : > { %455 = vmatprep.mubr.f32.mxu0 %v305_v52 }
  0x63   : > { %456 = vmatmul.mubr.f32.gmra.mrb[4].mxu0 %v304_v53 }
  0x64   : > { %460 = vmatprep.mubr.f32.mxu0 %v307_v54 }
  0x67   : > { %461 = vmatmul.mubr.f32.gmra.mrb[6].mxu0 %v306_v55 }
  0x68   : > { %465 = vmatprep.mubr.f32.mxu0 %v309_v56 }
  0x6b   : > { %466 = vmatmul.mubr.f32.gmra.mrb[8].mxu0 %v308_v57 }
  0x6c   : > { %470 = vmatprep.mubr.f32.mxu0 %v311_v58 }
  0x6f   : > { %471 = vmatmul.mubr.f32.gmra.mrb[10].mxu0 %v310_v59 }
  0x70   : > { %475 = vmatprep.mubr.f32.mxu0 %v313_v60 }
  0x73   : > { %476 = vmatmul.mubr.f32.gmra.mrb[12].mxu0 %v312_v61 }
  0x74   : > { %480 = vmatprep.mubr.f32.mxu0 %v315_v62 }
  0x77   : > { %481 = vmatmul.mubr.f32.gmra.mrb[14].mxu0 %v314_v63 }
  0x78   : > { %485 = vmatprep.mubr.f32.mxu0 %v317_v0 }
  0x7b   : > { %486 = vmatmul.mubr.f32.gmra.mrb[16].mxu0 %v316_v1 }
  0x7c   : > { %490 = vmatprep.mubr.f32.mxu0 %v319_v2 }
  0x7f   : > { %491 = vmatmul.mubr.f32.gmra.mrb[18].mxu0 %v318_v3 }
  0x80   : > { %495 = vmatprep.mubr.f32.mxu0 %v321_v4 }
  0x83   : > { %496 = vmatmul.mubr.f32.gmra.mrb[20].mxu0 %v320_v5 }
  0x84   : > { %500 = vmatprep.mubr.f32.mxu0 %v323_v6 }
  0x87   : > { %501 = vmatmul.mubr.f32.gmra.mrb[22].mxu0 %v322_v7 }
  0x88   : > { %505 = vmatprep.mubr.f32.mxu0 %v325_v8 }
  0x8b   : > { %506 = vmatmul.mubr.f32.gmra.mrb[24].mxu0 %v324_v9 }
  0x8c   : > { %510 = vmatprep.mubr.f32.mxu0 %v327_v10 }
  0x8f   : > { %511 = vmatmul.mubr.f32.gmra.mrb[26].mxu0 %v326_v11  ;;  %v333_v11 = vld [vmem:[%s3732_s2] sm:$0xff] }
  0x90   : > { %515 = vmatprep.mubr.f32.mxu0 %v329_v12 }
  0x93   : > { %516 = vmatmul.mubr.f32.gmra.mrb[28].mxu0 %v328_v13 }
  0x94   : > { %520 = vmatprep.mubr.f32.mxu0 %v331_v14 }
  0x97   : > { %521 = vmatmul.mubr.f32.gmra.mrb[30].mxu0 %v330_v15  ;;  %v334_v15 = vld [vmem:[%s3732_s2 + $0x8] sm:$0xff] }
  0x98   : > { %1840 = vmatprep.mubr.f32.mxu0 %v3079_v17 }
 0x12e   : > { %v2482_v18 = vpop.f32.mrb[0].mxu0 }
 0x12f   : > { %v2483_v19 = vpop.f32.mrb[1].mxu0 }
 0x130   : > { %v2484_v20 = vadd.f32 %v2483_v19, %v2482_v18  ;;  %v336_v18 = vld [vmem:[%s3732_s2 + $0x18] sm:$0xff] }
 0x132   : > { %v2485_v21 = vpop.f32.mrb[2].mxu0 }
 0x133   : > { %v2486_v22 = vpop.f32.mrb[3].mxu0 }
 0x134   : > { %v2487_v23 = vadd.f32 %v2486_v22, %v2485_v21 }
 0x136   : > { %v2488_v24 = vpop.f32.mrb[4].mxu0  ;;  %v2731_v25 = vpack.c.bf16 %v2487_v23, %v2484_v20 }
 0x137   : > { %v2489_v26 = vpop.f32.mrb[5].mxu0 }
 0x138   : > { %v2490_v27 = vadd.f32 %v2489_v26, %v2488_v24  ;;  %2732 = vmatpush3.bf16.msra.mxu1 %v2731_v25 }
 0x139   : > { %2733 = vmatprep.subr.bf16.mxu1 %v3077_v16 }
 0x13a   : > { %v2491_v28 = vpop.f32.mrb[6].mxu0 }
 0x13b   : > { %v2492_v29 = vpop.f32.mrb[7].mxu0 }
 0x13c   : > { %v2493_v30 = vadd.f32 %v2492_v29, %v2491_v28  ;;  %v337_v28 = vld [vmem:[%s3733_s3] sm:$0xff] }
 0x13e   : > { %v2734_v31 = vpack.c.bf16 %v2493_v30, %v2490_v27  ;;  %v2494_v32 = vpop.f32.mrb[8].mxu0  ;;  %v338_v30 = vld [vmem:[%s3733_s3 + $0x8] sm:$0xff] }
 0x13f   : > { %v2495_v33 = vpop.f32.mrb[9].mxu0 }
 0x140   : > { %v2496_v34 = vadd.f32 %v2495_v33, %v2494_v32  ;;  %2735 = vmatpush3.bf16.msra.mxu1 %v2734_v31  ;;  %v339_v31 = vld [vmem:[%s3733_s3 + $0x10] sm:$0xff]  ;;  %v340_v32 = vld [vmem:[%s3733_s3 + $0x18] sm:$0xff]  ;;  %v374_v33 = vld [vmem:[%s3735_s5 + $0x8] sm:$0xff] }
 0x141   : > { %2736 = vmatprep.subr.bf16.mxu1 %v3077_v16 }
 0x142   : > { %v2497_v36 = vpop.f32.mrb[10].mxu0 }
 0x143   : > { %v2498_v37 = vpop.f32.mrb[11].mxu0  ;;  %2599 = vmatmul.mubr.msk.f32.vlgmr.msra.gmra.mrb[0].mxu1 %vm526_vm1, %v332_v35 }
 0x144   : > { %v2499_v38 = vadd.f32 %v2498_v37, %v2497_v36  ;;  %2609 = vmatprep.mubr.msk.f32.mxu1 %vm3078_vm0, %v3079_v17  ;;  %v373_v36 = vld [vmem:[%s3735_s5] sm:$0xff]  ;;  %v375_v37 = vld [vmem:[%s3735_s5 + $0x10] sm:$0xff] }
 0x146   : > { %v2737_v39 = vpack.c.bf16 %v2499_v38, %v2496_v34  ;;  %v2500_v40 = vpop.f32.mrb[12].mxu0  ;;  %v376_v34 = vld [vmem:[%s3735_s5 + $0x18] sm:$0xff]  ;;  %v2756_v38 = vpack.c.bf16 %v375_v37, %v373_v36 }
 0x147   : > { %v2501_v41 = vpop.f32.mrb[13].mxu0 }
 0x148   : > { %v2502_v42 = vadd.f32 %v2501_v41, %v2500_v40  ;;  %2738 = vmatpush3.bf16.msra.mxu1 %v2737_v39 }
 0x149   : > { %2739 = vmatprep.subr.bf16.mxu1 %v3077_v16 }
 0x14a   : > { %v2503_v43 = vpop.f32.mrb[14].mxu0 }
 0x14b   : > { %v2504_v44 = vpop.f32.mrb[15].mxu0 }
 0x14c   : > { %v2505_v45 = vadd.f32 %v2504_v44, %v2503_v43 }
 0x14e   : > { %v2740_v46 = vpack.c.bf16 %v2505_v45, %v2502_v42  ;;  %v2506_v47 = vpop.f32.mrb[16].mxu0 }
 0x14f   : > { %v2507_v48 = vpop.f32.mrb[17].mxu0 }
 0x150   : > { %v2508_v49 = vadd.f32 %v2507_v48, %v2506_v47  ;;  %2741 = vmatpush3.bf16.msra.mxu1 %v2740_v46 }
 0x151   : > { %2742 = vmatprep.subr.bf16.mxu1 %v3077_v16 }
 0x152   : > { %v2509_v50 = vpop.f32.mrb[18].mxu0 }
 0x153   : > { %v2510_v51 = vpop.f32.mrb[19].mxu0  ;;  %2610 = vmatmul.mubr.msk.f32.vlgmr.msra.gmra.mrb[2].mxu1 %vm526_vm1, %v332_v35 }
 0x154   : > { %v2511_v52 = vadd.f32 %v2510_v51, %v2509_v50  ;;  %2620 = vmatprep.mubr.msk.f32.mxu1 %vm3078_vm0, %v3079_v17  ;;  %v378_v50 = vld [vmem:[%s3736_s6 + $0x8] sm:$0xff]  ;;  %v380_v51 = vld [vmem:[%s3736_s6 + $0x18] sm:$0xff] }
 0x156   : > { %v2743_v53 = vpack.c.bf16 %v2511_v52, %v2508_v49  ;;  %v2512_v54 = vpop.f32.mrb[20].mxu0  ;;  %v2758_v52 = vpack.c.bf16 %v380_v51, %v378_v50 }
 0x157   : > { %v2513_v55 = vpop.f32.mrb[21].mxu0 }
 0x158   : > { %v2514_v56 = vadd.f32 %v2513_v55, %v2512_v54  ;;  %2744 = vmatpush3.bf16.msra.mxu1 %v2743_v53  ;;  %v377_v53 = vld [vmem:[%s3736_s6] sm:$0xff]  ;;  %v379_v54 = vld [vmem:[%s3736_s6 + $0x10] sm:$0xff] }
 0x159   : > { %2745 = vmatprep.subr.bf16.mxu1 %v3077_v16  ;;  %v2760_v55 = vpack.c.bf16 %v379_v54, %v377_v53 }
 0x15a   : > { %v2515_v57 = vpop.f32.mrb[22].mxu0 }
 0x15b   : > { %v2516_v58 = vpop.f32.mrb[23].mxu0 }
 0x15c   : > { %v2517_v59 = vadd.f32 %v2516_v58, %v2515_v57 }
 0x15e   : > { %v2746_v60 = vpack.c.bf16 %v2517_v59, %v2514_v56  ;;  %v2518_v61 = vpop.f32.mrb[24].mxu0 }
 0x15f   : > { %v2519_v62 = vpop.f32.mrb[25].mxu0 }
 0x160   : > { %v2520_v63 = vadd.f32 %v2519_v62, %v2518_v61  ;;  %2747 = vmatpush3.bf16.msra.mxu1 %v2746_v60 }
 0x161   : > { %2748 = vmatprep.subr.bf16.mxu1 %v3077_v16 }
 0x162   : > { %v2521_v0 = vpop.f32.mrb[26].mxu0 }
 0x163   : > { %v2522_v1 = vpop.f32.mrb[27].mxu0  ;;  %2621 = vmatmul.mubr.msk.f32.vlgmr.msra.gmra.mrb[4].mxu1 %vm526_vm1, %v332_v35 }
 0x164   : > { %v2523_v2 = vadd.f32 %v2522_v1, %v2521_v0  ;;  %2631 = vmatprep.mubr.msk.f32.mxu1 %vm3078_vm0, %v3079_v17 }
 0x166   : > { %v2749_v3 = vpack.c.bf16 %v2523_v2, %v2520_v63  ;;  %v2524_v4 = vpop.f32.mrb[28].mxu0 }
 0x167   : > { %v2525_v5 = vpop.f32.mrb[29].mxu0 }
 0x168   : > { %v2526_v6 = vadd.f32 %v2525_v5, %v2524_v4  ;;  %2750 = vmatpush3.bf16.msra.mxu1 %v2749_v3 }
 0x169   : > { %2751 = vmatprep.subr.bf16.mxu1 %v3077_v16  ;;  %v335_v16 = vld [vmem:[%s3732_s2 + $0x10] sm:$0xff] }
 0x16a   : > { %v2527_v7 = vpop.f32.mrb[30].mxu0 }
 0x16b   : > { %v2528_v8 = vpop.f32.mrb[31].mxu0 }
 0x16c   : > { %v2529_v9 = vadd.f32 %v2528_v8, %v2527_v7 }
 0x16e   : > { %v2752_v10 = vpack.c.bf16 %v2529_v9, %v2526_v6 }
 0x170   : > { %2753 = vmatpush3.bf16.msra.mxu1 %v2752_v10 }
 0x173   : > { %2632 = vmatmul.mubr.msk.f32.vlgmr.msra.gmra.mrb[6].mxu1 %vm526_vm1, %v332_v35  ;;  %v2754_v35 = vpack.c.bf16 %v376_v34, %v374_v33 }
 0x174   : > { %2636 = vmatprep.mubr.msk.f32.mxu1 %vm814_vm2, %v333_v11 }
 0x175   : > { %2755 = vmatprep.subr.bf16.mxu0 %v2754_v35 }
 0x176   : > { %2757 = vmatpush1.bf16.msra.mxu0 %v2756_v38 }
 0x216   : > { %v596_v12 = vpop.f32.mrb[0].mxu1 }
 0x217   : > { %v810_v13 = vmax.f32 %v596_v12, 0.0  ;;  %v2600_v14 = vpop.f32.mrb[1].mxu1 }
 0x219   : > { %1264 = vrot.lane.b32.xlu0 %v810_v13, %s3080_s19  ;;  %2634 = vmatprep.subr.mxu1 %v810_v13 }
 0x21a   : > { %2635 = vmatpush3.msra.mxu1 %v810_v13 }
 0x21b   : > { %2637 = vmatmul.mubr.msk.f32.vlgmr.msra.gmra.mrb[8].mxu1 %vm814_vm2, %v334_v15 }
 0x21c   : > { %2639 = vmatprep.mubr.msk.f32.mxu1 %vm814_vm2, %v335_v16 }
 0x21f   : > { %2640 = vmatmul.mubr.msk.f32.gmra.mrb[10].mxu1 %vm814_vm2, %v336_v18 }
 0x220   : > { %2644 = vmatprep.mubr.msk.f32.mxu1 %vm814_vm2, %v333_v11 }
 0x226   : > { %v666_v19 = vpop.f32.mrb[2].mxu1 }
 0x227   : > { %v811_v20 = vmax.f32 %v666_v19, 0.0  ;;  %v2611_v21 = vpop.f32.mrb[3].mxu1 }
 0x229   : > { %1365 = vrot.lane.b32.xlu0 %v811_v20, %s3080_s19  ;;  %2642 = vmatprep.subr.mxu1 %v811_v20 }
 0x22a   : > { %2643 = vmatpush3.msra.mxu1 %v811_v20 }
 0x22b   : > { %2645 = vmatmul.mubr.msk.f32.vlgmr.msra.gmra.mrb[12].mxu1 %vm814_vm2, %v334_v15 }
 0x22c   : > { %2647 = vmatprep.mubr.msk.f32.mxu1 %vm814_vm2, %v335_v16 }
 0x22f   : > { %2648 = vmatmul.mubr.msk.f32.gmra.mrb[14].mxu1 %vm814_vm2, %v336_v18 }
 0x230   : > { %2652 = vmatprep.mubr.msk.f32.mxu1 %vm814_vm2, %v333_v11 }
 0x236   : > { %v736_v22 = vpop.f32.mrb[4].mxu1 }
 0x237   : > { %v812_v23 = vmax.f32 %v736_v22, 0.0  ;;  %v2622_v24 = vpop.f32.mrb[5].mxu1 }
 0x239   : > { %1454 = vrot.lane.b32.xlu1 %v812_v23, %s3080_s19  ;;  %2650 = vmatprep.subr.mxu1 %v812_v23 }
 0x23a   : > { %2651 = vmatpush3.msra.mxu1 %v812_v23 }
 0x23b   : > { %2653 = vmatmul.mubr.msk.f32.vlgmr.msra.gmra.mrb[16].mxu1 %vm814_vm2, %v334_v15 }
 0x23c   : > { %2655 = vmatprep.mubr.msk.f32.mxu1 %vm814_vm2, %v335_v16 }
 0x23f   : > { %2656 = vmatmul.mubr.msk.f32.gmra.mrb[18].mxu1 %vm814_vm2, %v336_v18 }
 0x240   : > { %2660 = vmatprep.mubr.msk.f32.mxu1 %vm814_vm2, %v333_v11 }
 0x246   : > { %v806_v25 = vpop.f32.mrb[6].mxu1 }
 0x247   : > { %v813_v26 = vmax.f32 %v806_v25, 0.0  ;;  %v2633_v27 = vpop.f32.mrb[7].mxu1 }
 0x249   : > { %1543 = vrot.lane.b32.xlu1 %v813_v26, %s3080_s19  ;;  %2658 = vmatprep.subr.mxu1 %v813_v26  ;;  %s3682_s19 = scalar_lea.hbm %s3737_s7, %s2449_s17 }
 0x24a   : > { %2659 = vmatpush3.msra.mxu1 %v813_v26 }
 0x24b   : > { %2661 = vmatmul.mubr.msk.f32.vlgmr.msra.gmra.mrb[20].mxu1 %vm814_vm2, %v334_v15 }
 0x24c   : > { %2663 = vmatprep.mubr.msk.f32.mxu1 %vm814_vm2, %v335_v16 }
 0x24f   : > { %2664 = vmatmul.mubr.msk.f32.gmra.mrb[22].mxu1 %vm814_vm2, %v336_v18 }
 0x250   : > { %2668 = vmatprep.mubr.msk.f32.mxu1 %vm814_vm2, %v337_v28 }
 0x28b   : > { %v1265_v29 = vpop.permute.xlu0 %1264 }
 0x28c   : > { %2666 = vmatprep.subr.mxu1 %v1265_v29 }
 0x28d   : > { %2667 = vmatpush3.msra.mxu1 %v1265_v29 }
 0x28e   : > { %2669 = vmatmul.mubr.msk.f32.vlgmr.msra.gmra.mrb[24].mxu1 %vm814_vm2, %v338_v30 }
 0x28f   : > { %2671 = vmatprep.mubr.msk.f32.mxu1 %vm814_vm2, %v339_v31 }
 0x292   : > { %2672 = vmatmul.mubr.msk.f32.gmra.mrb[26].mxu1 %vm814_vm2, %v340_v32 }
 0x293   : > { %2676 = vmatprep.mubr.msk.f32.mxu1 %vm814_vm2, %v337_v28 }
 0x29b   : > { %v1366_v39 = vpop.permute.xlu0 %1365 }
 0x29c   : > { %2674 = vmatprep.subr.mxu1 %v1366_v39 }
 0x29d   : > { %2675 = vmatpush3.msra.mxu1 %v1366_v39 }
 0x29e   : > { %2677 = vmatmul.mubr.msk.f32.vlgmr.msra.gmra.mrb[28].mxu1 %vm814_vm2, %v338_v30 }
 0x29f   : > { %2679 = vmatprep.mubr.msk.f32.mxu1 %vm814_vm2, %v339_v31 }
 0x2a2   : > { %2680 = vmatmul.mubr.msk.f32.gmra.mrb[30].mxu1 %vm814_vm2, %v340_v32 }
 0x2a3   : > { %2684 = vmatprep.mubr.msk.f32.mxu1 %vm814_vm2, %v337_v28 }
 0x2ab   : > { %v1455_v40 = vpop.permute.xlu1 %1454 }
 0x2ac   : > { %2682 = vmatprep.subr.mxu1 %v1455_v40 }
 0x2ad   : > { %2683 = vmatpush3.msra.mxu1 %v1455_v40 }
 0x2ae   : > { %2685 = vmatmul.mubr.msk.f32.vlgmr.msra.gmra.mrb[32].mxu1 %vm814_vm2, %v338_v30 }
 0x2af   : > { %2687 = vmatprep.mubr.msk.f32.mxu1 %vm814_vm2, %v339_v31 }
 0x2b2   : > { %2688 = vmatmul.mubr.msk.f32.gmra.mrb[34].mxu1 %vm814_vm2, %v340_v32 }
 0x2b3   : > { %2692 = vmatprep.mubr.msk.f32.mxu1 %vm814_vm2, %v337_v28 }
 0x2bb   : > { %v1544_v41 = vpop.permute.xlu1 %1543 }
 0x2bc   : > { %2690 = vmatprep.subr.mxu1 %v1544_v41 }
 0x2bd   : > { %2691 = vmatpush3.msra.mxu1 %v1544_v41 }
 0x2be   : > { %2693 = vmatmul.mubr.msk.f32.vlgmr.msra.gmra.mrb[36].mxu1 %vm814_vm2, %v338_v30  ;;  %2759 = vmatprep.subr.bf16.mxu1 %v2758_v52 }
 0x2bf   : > { %2695 = vmatprep.mubr.msk.f32.mxu1 %vm814_vm2, %v339_v31  ;;  %2761 = vmatpush1.bf16.msra.mxu1 %v2760_v55 }
 0x2c2   : > { %2696 = vmatmul.mubr.msk.f32.gmra.mrb[38].mxu1 %vm814_vm2, %v340_v32 }
 0x2c3   : > { %2049 = vmatprep.mubr.f32.mxu1 %v3079_v17 }
 0x2ee   : > { %v2638_v42 = vpop.f32.mrb[8].mxu1 }
 0x2ef   : > { %v2361_v43 = vmul.f32 -1.442695, %v2638_v42  ;;  %v893_v44 = vpop.f32.mrb[9].mxu1 }
 0x2f0   : > { %v2360_v45 = vmul.f32 -1.442695, %v893_v44 }
 0x2f1   : > { %2816 = vpow2.f32 %v2361_v43 }
 0x2f2   : > { %2818 = vpow2.f32 %v2360_v45  ;;  %v2641_v46 = vpop.f32.mrb[10].mxu1 }
 0x2f3   : > { %v903_v47 = vpop.f32.mrb[11].mxu1  ;;  %v2363_v48 = vmul.f32 -1.442695, %v2641_v46 }
 0x2f4   : > { %v2362_v49 = vmul.f32 -1.442695, %v903_v47 }
 0x2f6   : > { %2820 = vpow2.f32 %v2362_v49 }
 0x2f7   : > { %2822 = vpow2.f32 %v2363_v48 }
 0x2fb   : > { %v2817_v56 = vpop.eup %2816 }
 0x2fc   : > { %v2819_v57 = vpop.eup %2818  ;;  %v1216_v58 = vadd.f32 1.0, %v2817_v56 }
 0x2fd   : > { %v1215_v59 = vadd.f32 1.0, %v2819_v57 }
 0x2fe   : > { %v2646_v60 = vpop.f32.mrb[12].mxu1 }
 0x2ff   : > { %2824 = vrcp.f32 %v1215_v59  ;;  %v2365_v61 = vmul.f32 -1.442695, %v2646_v60  ;;  %v978_v62 = vpop.f32.mrb[13].mxu1 }
 0x300   : > { %v2821_v63 = vpop.eup %2820  ;;  %v2364_v0 = vmul.f32 -1.442695, %v978_v62  ;;  %2826 = vrcp.f32 %v1216_v58 }
 0x301   : > { %v1217_v1 = vadd.f32 1.0, %v2821_v63  ;;  %v2823_v2 = vpop.eup %2822  ;;  %2828 = vpow2.f32 %v2365_v61 }
 0x302   : > { %v2649_v3 = vpop.f32.mrb[14].mxu1  ;;  %2830 = vpow2.f32 %v2364_v0  ;;  %v1218_v6 = vadd.f32 1.0, %v2823_v2 }
 0x303   : > { %v988_v4 = vpop.f32.mrb[15].mxu1  ;;  %2832 = vrcp.f32 %v1217_v1  ;;  %v2367_v7 = vmul.f32 -1.442695, %v2649_v3 }
 0x304   : > { %v2366_v5 = vmul.f32 -1.442695, %v988_v4 }
 0x306   : > { %2834 = vpow2.f32 %v2366_v5 }
 0x307   : > { %2836 = vrcp.f32 %v1218_v6 }
 0x308   : > { %2838 = vpow2.f32 %v2367_v7 }
 0x309   : > { %v2825_v8 = vpop.eup %2824 }
 0x30a   : > { %2408 = vmatmul.mubr.msk.f32.vlgmr.msra.gmra.mrb[32].mxu0 %vm1727_vm3, %v2825_v8  ;;  %v2827_v9 = vpop.eup %2826 }
 0x30b   : > { %1846 = vmatprep.mubr.f32.mxu0 %v3079_v17  ;;  %v2829_v10 = vpop.eup %2828 }
 0x30c   : > { %v2831_v11 = vpop.eup %2830  ;;  %v1220_v14 = vadd.f32 1.0, %v2829_v10 }
 0x30d   : > { %v2833_v13 = vpop.eup %2832  ;;  %v1219_v15 = vadd.f32 1.0, %v2831_v11 }
 0x30e   : > { %v2654_v12 = vpop.f32.mrb[16].mxu1  ;;  %2409 = vmatmul.mubr.msk.f32.gmra.mrb[34].mxu0 %vm1727_vm3, %v2827_v9 }
 0x30f   : > { %v1063_v16 = vpop.f32.mrb[17].mxu1  ;;  %1852 = vmatprep.mubr.f32.mxu0 %v3079_v17  ;;  %v2369_v19 = vmul.f32 -1.442695, %v2654_v12  ;;  %2840 = vrcp.f32 %v1219_v15 }
 0x310   : > { %v2835_v18 = vpop.eup %2834  ;;  %v2368_v20 = vmul.f32 -1.442695, %v1063_v16  ;;  %2842 = vrcp.f32 %v1220_v14 }
 0x311   : > { %v1221_v21 = vadd.f32 1.0, %v2835_v18  ;;  %v2837_v23 = vpop.eup %2836  ;;  %2844 = vpow2.f32 %v2369_v19 }
 0x312   : > { %2410 = vmatmul.mubr.msk.f32.gmra.mrb[36].mxu0 %vm1727_vm3, %v2833_v13  ;;  %v2657_v22 = vpop.f32.mrb[18].mxu1  ;;  %v2839_v25 = vpop.eup %2838  ;;  %2846 = vpow2.f32 %v2368_v20 }
 0x313   : > { %1858 = vmatprep.mubr.f32.mxu0 %v3079_v17  ;;  %v1073_v24 = vpop.f32.mrb[19].mxu1  ;;  %2848 = vrcp.f32 %v1221_v21  ;;  %v2371_v27 = vmul.f32 -1.442695, %v2657_v22  ;;  %v1222_v28 = vadd.f32 1.0, %v2839_v25 }
 0x314   : > { %v2370_v26 = vmul.f32 -1.442695, %v1073_v24 }
 0x316   : > { %2411 = vmatmul.mubr.msk.f32.gmra.mrb[38].mxu0 %vm1727_vm3, %v2837_v23  ;;  %2850 = vpow2.f32 %v2370_v26 }
 0x317   : > { %1864 = vmatprep.mubr.f32.mxu0 %v3079_v17  ;;  %2852 = vpow2.f32 %v2371_v27 }
 0x318   : > { %2854 = vrcp.f32 %v1222_v28 }
 0x319   : > { %v2841_v29 = vpop.eup %2840 }
 0x31a   : > { %2412 = vmatmul.mubr.msk.f32.gmra.mrb[40].mxu0 %vm1727_vm3, %v2841_v29  ;;  %v2843_v30 = vpop.eup %2842 }
 0x31b   : > { %1870 = vmatprep.mubr.f32.mxu0 %v3079_v17  ;;  %v2845_v31 = vpop.eup %2844 }
 0x31c   : > { %v2847_v33 = vpop.eup %2846  ;;  %v1224_v36 = vadd.f32 1.0, %v2845_v31 }
 0x31d   : > { %v2849_v35 = vpop.eup %2848  ;;  %v1223_v37 = vadd.f32 1.0, %v2847_v33 }
 0x31e   : > { %v2662_v32 = vpop.f32.mrb[20].mxu1  ;;  %2413 = vmatmul.mubr.msk.f32.gmra.mrb[42].mxu0 %vm1727_vm3, %v2843_v30 }
 0x31f   : > { %v1148_v34 = vpop.f32.mrb[21].mxu1  ;;  %v2373_v39 = vmul.f32 -1.442695, %v2662_v32  ;;  %1876 = vmatprep.mubr.f32.mxu0 %v3079_v17  ;;  %2856 = vrcp.f32 %v1223_v37 }
 0x320   : > { %v2851_v38 = vpop.eup %2850  ;;  %v2372_v40 = vmul.f32 -1.442695, %v1148_v34  ;;  %2858 = vrcp.f32 %v1224_v36 }
 0x321   : > { %v1225_v42 = vadd.f32 1.0, %v2851_v38  ;;  %v2853_v44 = vpop.eup %2852  ;;  %2860 = vpow2.f32 %v2373_v39 }
 0x322   : > { %v2665_v41 = vpop.f32.mrb[22].mxu1  ;;  %2414 = vmatmul.mubr.msk.f32.gmra.mrb[44].mxu0 %vm1727_vm3, %v2849_v35  ;;  %v2855_v46 = vpop.eup %2854  ;;  %2862 = vpow2.f32 %v2372_v40  ;;  %v1226_v47 = vadd.f32 1.0, %v2853_v44 }
 0x323   : > { %v1158_v43 = vpop.f32.mrb[23].mxu1  ;;  %1882 = vmatprep.mubr.f32.mxu0 %v3079_v17  ;;  %2864 = vrcp.f32 %v1225_v42  ;;  %v2375_v48 = vmul.f32 -1.442695, %v2665_v41 }
 0x324   : > { %v2374_v45 = vmul.f32 -1.442695, %v1158_v43 }
 0x326   : > { %2415 = vmatmul.mubr.msk.f32.gmra.mrb[46].mxu0 %vm1727_vm3, %v2855_v46  ;;  %2866 = vpow2.f32 %v2374_v45 }
 0x327   : > { %1888 = vmatprep.mubr.f32.mxu0 %v3079_v17  ;;  %2868 = vrcp.f32 %v1226_v47 }
 0x328   : > { %2870 = vpow2.f32 %v2375_v48 }
 0x329   : > { %v2857_v49 = vpop.eup %2856 }
 0x32a   : > { %2416 = vmatmul.mubr.msk.f32.gmra.mrb[48].mxu0 %vm1727_vm3, %v2857_v49  ;;  %v2859_v50 = vpop.eup %2858 }
 0x32b   : > { %1894 = vmatprep.mubr.f32.mxu0 %v3079_v17  ;;  %v2861_v51 = vpop.eup %2860 }
 0x32c   : > { %v2863_v52 = vpop.eup %2862  ;;  %v1228_v54 = vadd.f32 1.0, %v2861_v51 }
 0x32d   : > { %v2865_v53 = vpop.eup %2864  ;;  %v1227_v55 = vadd.f32 1.0, %v2863_v52 }
 0x32e   : > { %2417 = vmatmul.mubr.msk.f32.gmra.mrb[50].mxu0 %vm1727_vm3, %v2859_v50 }
 0x32f   : > { %1900 = vmatprep.mubr.f32.mxu0 %v3079_v17  ;;  %2872 = vrcp.f32 %v1227_v55 }
 0x330   : > { %v2867_v56 = vpop.eup %2866  ;;  %2874 = vrcp.f32 %v1228_v54 }
 0x331   : > { %v2869_v57 = vpop.eup %2868  ;;  %v1229_v58 = vadd.f32 1.0, %v2867_v56 }
 0x332   : > { %2418 = vmatmul.mubr.msk.f32.gmra.mrb[52].mxu0 %vm1727_vm3, %v2865_v53  ;;  %v2871_v59 = vpop.eup %2870 }
 0x333   : > { %1906 = vmatprep.mubr.f32.mxu0 %v3079_v17  ;;  %v1230_v60 = vadd.f32 1.0, %v2871_v59  ;;  %2876 = vrcp.f32 %v1229_v58 }
 0x335   : > { %2878 = vrcp.f32 %v1230_v60 }
 0x336   : > { %2419 = vmatmul.mubr.msk.f32.gmra.mrb[54].mxu0 %vm1727_vm3, %v2869_v57 }
 0x337   : > { %1912 = vmatprep.mubr.f32.mxu0 %v3079_v17 }
 0x339   : > { %v2873_v61 = vpop.eup %2872 }
 0x33a   : > { %2420 = vmatmul.mubr.msk.f32.gmra.mrb[56].mxu0 %vm1727_vm3, %v2873_v61  ;;  %v2875_v62 = vpop.eup %2874 }
 0x33b   : > { %1918 = vmatprep.mubr.f32.mxu0 %v3079_v17 }
 0x33d   : > { %v2877_v63 = vpop.eup %2876 }
 0x33e   : > { %2421 = vmatmul.mubr.msk.f32.gmra.mrb[58].mxu0 %vm1727_vm3, %v2875_v62 }
 0x33f   : > { %1924 = vmatprep.mubr.f32.mxu0 %v3079_v17  ;;  %v2879_v0 = vpop.eup %2878 }
 0x342   : > { %2422 = vmatmul.mubr.msk.f32.gmra.mrb[60].mxu0 %vm1727_vm3, %v2877_v63 }
 0x343   : > { %1930 = vmatprep.mubr.f32.mxu0 %v3079_v17 }
 0x346   : > { %2423 = vmatmul.mubr.msk.f32.gmra.mrb[62].mxu0 %vm1727_vm3, %v2879_v0 }
 0x361   : > { %v2670_v1 = vpop.f32.mrb[24].mxu1 }
 0x362   : > { %v2393_v2 = vmul.f32 -1.442695, %v2670_v1  ;;  %v1345_v3 = vpop.f32.mrb[25].mxu1 }
 0x363   : > { %v2392_v4 = vmul.f32 -1.442695, %v1345_v3 }
 0x364   : > { %2880 = vpow2.f32 %v2393_v2 }
 0x365   : > { %2882 = vpow2.f32 %v2392_v4  ;;  %v2673_v5 = vpop.f32.mrb[26].mxu1 }
 0x366   : > { %v1355_v6 = vpop.f32.mrb[27].mxu1  ;;  %v2395_v8 = vmul.f32 -1.442695, %v2673_v5 }
 0x367   : > { %v2394_v7 = vmul.f32 -1.442695, %v1355_v6 }
 0x369   : > { %2884 = vpow2.f32 %v2394_v7 }
 0x36a   : > { %2886 = vpow2.f32 %v2395_v8 }
 0x36e   : > { %v2881_v9 = vpop.eup %2880 }
 0x36f   : > { %v2883_v10 = vpop.eup %2882  ;;  %v1680_v13 = vadd.f32 1.0, %v2881_v9 }
 0x370   : > { %v1679_v11 = vadd.f32 1.0, %v2883_v10 }
 0x371   : > { %v2678_v12 = vpop.f32.mrb[28].mxu1 }
 0x372   : > { %2888 = vrcp.f32 %v1679_v11  ;;  %v2397_v14 = vmul.f32 -1.442695, %v2678_v12  ;;  %v1434_v15 = vpop.f32.mrb[29].mxu1 }
 0x373   : > { %v2885_v16 = vpop.eup %2884  ;;  %v2396_v18 = vmul.f32 -1.442695, %v1434_v15 }
 0x374   : > { %v1681_v19 = vadd.f32 1.0, %v2885_v16  ;;  %2890 = vpow2.f32 %v2397_v14  ;;  %v2887_v22 = vpop.eup %2886 }
 0x375   : > { %v2681_v20 = vpop.f32.mrb[30].mxu1  ;;  %2892 = vrcp.f32 %v1680_v13  ;;  %v1682_v24 = vadd.f32 1.0, %v2887_v22 }
 0x376   : > { %v1444_v21 = vpop.f32.mrb[31].mxu1  ;;  %2894 = vpow2.f32 %v2396_v18  ;;  %v2399_v25 = vmul.f32 -1.442695, %v2681_v20 }
 0x377   : > { %v2398_v23 = vmul.f32 -1.442695, %v1444_v21  ;;  %2896 = vrcp.f32 %v1681_v19 }
 0x379   : > { %2898 = vpow2.f32 %v2398_v23 }
 0x37a   : > { %2900 = vrcp.f32 %v1682_v24 }
 0x37b   : > { %2902 = vpow2.f32 %v2399_v25 }
 0x37c   : > { %v2889_v26 = vpop.eup %2888 }
 0x37d   : > { %2424 = vmatmul.mubr.msk.f32.vlgmr.msra.gmra.mrb[40].mxu1 %vm1727_vm3, %v2889_v26 }
 0x37e   : > { %2055 = vmatprep.mubr.f32.mxu1 %v3079_v17  ;;  %v2891_v27 = vpop.eup %2890 }
 0x37f   : > { %v2893_v28 = vpop.eup %2892  ;;  %v1684_v32 = vadd.f32 1.0, %v2891_v27 }
 0x380   : > { %v2895_v29 = vpop.eup %2894 }
 0x381   : > { %v2686_v30 = vpop.f32.mrb[32].mxu1  ;;  %2425 = vmatmul.mubr.msk.f32.gmra.mrb[42].mxu1 %vm1727_vm3, %v2893_v28  ;;  %v2897_v31 = vpop.eup %2896  ;;  %v1683_v33 = vadd.f32 1.0, %v2895_v29 }
 0x382   : > { %v1523_v34 = vpop.f32.mrb[33].mxu1  ;;  %2061 = vmatprep.mubr.f32.mxu1 %v3079_v17  ;;  %v2401_v36 = vmul.f32 -1.442695, %v2686_v30 }
 0x383   : > { %v2899_v35 = vpop.eup %2898  ;;  %2904 = vrcp.f32 %v1683_v33  ;;  %v2400_v37 = vmul.f32 -1.442695, %v1523_v34 }
 0x384   : > { %v1685_v38 = vadd.f32 1.0, %v2899_v35  ;;  %2906 = vrcp.f32 %v1684_v32  ;;  %v2901_v42 = vpop.eup %2900 }
 0x385   : > { %2426 = vmatmul.mubr.msk.f32.gmra.mrb[44].mxu1 %vm1727_vm3, %v2897_v31  ;;  %v2689_v39 = vpop.f32.mrb[34].mxu1  ;;  %2908 = vpow2.f32 %v2401_v36  ;;  %v2903_v43 = vpop.eup %2902 }
 0x386   : > { %2067 = vmatprep.mubr.f32.mxu1 %v3079_v17  ;;  %v1533_v40 = vpop.f32.mrb[35].mxu1  ;;  %2910 = vpow2.f32 %v2400_v37  ;;  %v2403_v44 = vmul.f32 -1.442695, %v2689_v39  ;;  %v1686_v45 = vadd.f32 1.0, %v2903_v43 }
 0x387   : > { %v2402_v41 = vmul.f32 -1.442695, %v1533_v40  ;;  %2912 = vrcp.f32 %v1685_v38 }
 0x389   : > { %2427 = vmatmul.mubr.msk.f32.gmra.mrb[46].mxu1 %vm1727_vm3, %v2901_v42  ;;  %2914 = vpow2.f32 %v2402_v41 }
 0x38a   : > { %2073 = vmatprep.mubr.f32.mxu1 %v3079_v17  ;;  %2916 = vpow2.f32 %v2403_v44 }
 0x38b   : > { %2918 = vrcp.f32 %v1686_v45 }
 0x38d   : > { %v2905_v46 = vpop.eup %2904 }
 0x38e   : > { %2428 = vmatmul.mubr.msk.f32.gmra.mrb[48].mxu1 %vm1727_vm3, %v2905_v46  ;;  %v2907_v47 = vpop.eup %2906 }
 0x38f   : > { %2079 = vmatprep.mubr.f32.mxu1 %v3079_v17  ;;  %v2909_v48 = vpop.eup %2908 }
 0x390   : > { %v2911_v50 = vpop.eup %2910  ;;  %v1688_v53 = vadd.f32 1.0, %v2909_v48 }
 0x391   : > { %v2694_v49 = vpop.f32.mrb[36].mxu1  ;;  %v2913_v52 = vpop.eup %2912  ;;  %v1687_v54 = vadd.f32 1.0, %v2911_v50  ;;  %v2944_v50 = vld [vmem:[%s3234_s15] sm:$0xff] }
 0x392   : > { %v1612_v51 = vpop.f32.mrb[37].mxu1  ;;  %2429 = vmatmul.mubr.msk.f32.gmra.mrb[50].mxu1 %vm1727_vm3, %v2907_v47  ;;  %v2405_v56 = vmul.f32 -1.442695, %v2694_v49 }
 0x393   : > { %v2915_v55 = vpop.eup %2914  ;;  %2085 = vmatprep.mubr.f32.mxu1 %v3079_v17  ;;  %2920 = vrcp.f32 %v1687_v54  ;;  %v2404_v57 = vmul.f32 -1.442695, %v1612_v51 }
 0x394   : > { %v1689_v59 = vadd.f32 1.0, %v2915_v55  ;;  %2922 = vrcp.f32 %v1688_v53  ;;  %v2917_v62 = vpop.eup %2916 }
 0x395   : > { %v2697_v58 = vpop.f32.mrb[38].mxu1  ;;  %2924 = vpow2.f32 %v2405_v56  ;;  %v2919_v63 = vpop.eup %2918  ;;  %v1690_v0 = vadd.f32 1.0, %v2917_v62 }
 0x396   : > { %v1622_v60 = vpop.f32.mrb[39].mxu1  ;;  %2430 = vmatmul.mubr.msk.f32.gmra.mrb[52].mxu1 %vm1727_vm3, %v2913_v52  ;;  %2926 = vpow2.f32 %v2404_v57  ;;  %v2407_v1 = vmul.f32 -1.442695, %v2697_v58  ;;  %v2945_v52 = vld [vmem:[%s3234_s15 + $0x8] sm:$0xff]  ;;  %v2946_v58 = vld [vmem:[%s3234_s15 + $0x10] sm:$0xff] }
 0x397   : > { %v2406_v61 = vmul.f32 -1.442695, %v1622_v60  ;;  %2091 = vmatprep.mubr.f32.mxu1 %v3079_v17  ;;  %2928 = vrcp.f32 %v1689_v59  ;;  %v2947_v60 = vld [vmem:[%s3234_s15 + $0x18] sm:$0xff] }
 0x399   : > { %2930 = vpow2.f32 %v2406_v61 }
 0x39a   : > { %2431 = vmatmul.mubr.msk.f32.gmra.mrb[54].mxu1 %vm1727_vm3, %v2919_v63  ;;  %2932 = vrcp.f32 %v1690_v0 }
 0x39b   : > { %2097 = vmatprep.mubr.f32.mxu1 %v3079_v17  ;;  %2934 = vpow2.f32 %v2407_v1 }
 0x39d   : > { %v2921_v2 = vpop.eup %2920 }
 0x39e   : > { %2432 = vmatmul.mubr.msk.f32.gmra.mrb[56].mxu1 %vm1727_vm3, %v2921_v2  ;;  %v2923_v3 = vpop.eup %2922  ;;  %v2948_v2 = vld [vmem:[%s3234_s15 + $0x20] sm:$0xff] }
 0x39f   : > { %2103 = vmatprep.mubr.f32.mxu1 %v3079_v17  ;;  %v2925_v4 = vpop.eup %2924 }
 0x3a0   : > { %v2927_v5 = vpop.eup %2926  ;;  %v1692_v9 = vadd.f32 1.0, %v2925_v4  ;;  %v2949_v4 = vld [vmem:[%s3234_s15 + $0x28] sm:$0xff] }
 0x3a1   : > { %v2929_v6 = vpop.eup %2928  ;;  %v1691_v7 = vadd.f32 1.0, %v2927_v5 }
 0x3a2   : > { %2433 = vmatmul.mubr.msk.f32.gmra.mrb[58].mxu1 %vm1727_vm3, %v2923_v3 }
 0x3a3   : > { %v2931_v8 = vpop.eup %2930  ;;  %2109 = vmatprep.mubr.f32.mxu1 %v3079_v17  ;;  %2936 = vrcp.f32 %v1691_v7 }
 0x3a4   : > { %v1693_v10 = vadd.f32 1.0, %v2931_v8  ;;  %v2933_v11 = vpop.eup %2932  ;;  %2938 = vrcp.f32 %v1692_v9 }
 0x3a5   : > { %v2935_v12 = vpop.eup %2934 }
 0x3a6   : > { %2434 = vmatmul.mubr.msk.f32.gmra.mrb[60].mxu1 %vm1727_vm3, %v2929_v6  ;;  %2940 = vrcp.f32 %v1693_v10  ;;  %v1694_v13 = vadd.f32 1.0, %v2935_v12  ;;  %v2950_v10 = vld [vmem:[%s3234_s15 + $0x30] sm:$0xff]  ;;  %v2951_v12 = vld [vmem:[%s3234_s15 + $0x38] sm:$0xff] }
 0x3a7   : > { %2115 = vmatprep.mubr.f32.mxu1 %v3079_v17 }
 0x3a8   : > { %2942 = vrcp.f32 %v1694_v13 }
 0x3aa   : > { %2435 = vmatmul.mubr.msk.f32.gmra.mrb[62].mxu1 %vm1727_vm3, %v2933_v11 }
 0x3ab   : > { %2121 = vmatprep.mubr.f32.mxu1 %v3079_v17 }
 0x3ad   : > { %v2937_v14 = vpop.eup %2936 }
 0x3ae   : > { %2436 = vmatmul.mubr.msk.f32.gmra.mrb[64].mxu1 %vm1727_vm3, %v2937_v14  ;;  %v2939_v15 = vpop.eup %2938 }
 0x3af   : > { %2127 = vmatprep.mubr.f32.mxu1 %v3079_v17 }
 0x3b0   : > { %v2941_v16 = vpop.eup %2940 }
 0x3b2   : > { %2437 = vmatmul.mubr.msk.f32.gmra.mrb[66].mxu1 %vm1727_vm3, %v2939_v15  ;;  %v2943_v18 = vpop.eup %2942 }
 0x3b3   : > { %2133 = vmatprep.mubr.f32.mxu1 %v3079_v17 }
 0x3b6   : > { %2438 = vmatmul.mubr.msk.f32.gmra.mrb[68].mxu1 %vm1727_vm3, %v2941_v16 }
 0x3b7   : > { %2139 = vmatprep.mubr.f32.mxu1 %v3079_v17 }
 0x3ba   : > { %2439 = vmatmul.mubr.msk.f32.gmra.mrb[70].mxu1 %vm1727_vm3, %v2943_v18 }
 0x3dd   : > { %v1842_v19 = vpop.f32.mrb[32].mxu0 }
 0x3de   : > { %v1844_v20 = vpop.f32.mrb[33].mxu0  ;;  %v2146_v51 = vmul.f32 %v2944_v50, %v1842_v19  ;;  %v2952_v19 = vld [vmem:[%s3234_s15 + $0x40] sm:$0xff]  ;;  %v2954_v50 = vld [vmem:[%s3234_s15 + $0x50] sm:$0xff] }
 0x3df   : > { %v2147_v53 = vmul.f32 %v2945_v52, %v1844_v20  ;;  %v2955_v52 = vld [vmem:[%s3234_s15 + $0x58] sm:$0xff] }
 0x3e1   : > { %v1848_v21 = vpop.f32.mrb[34].mxu0 }
 0x3e2   : > { %v1850_v22 = vpop.f32.mrb[35].mxu0  ;;  %v2148_v59 = vmul.f32 %v2946_v58, %v1848_v21  ;;  %v2953_v21 = vld [vmem:[%s3234_s15 + $0x48] sm:$0xff] }
 0x3e3   : > { %v2149_v61 = vmul.f32 %v2947_v60, %v1850_v22  ;;  %v2957_v58 = vld [vmem:[%s3234_s15 + $0x68] sm:$0xff] }
 0x3e5   : > { %v1854_v23 = vpop.f32.mrb[36].mxu0 }
 0x3e6   : > { %v1856_v24 = vpop.f32.mrb[37].mxu0  ;;  %v2150_v3 = vmul.f32 %v2948_v2, %v1854_v23 }
 0x3e7   : > { %v2151_v5 = vmul.f32 %v2949_v4, %v1856_v24  ;;  %v2960_v4 = vld [vmem:[%s3234_s15 + $0x80] sm:$0xff] }
 0x3e9   : > { %v1860_v25 = vpop.f32.mrb[38].mxu0 }
 0x3ea   : > { %v1862_v26 = vpop.f32.mrb[39].mxu0  ;;  %v2152_v11 = vmul.f32 %v2950_v10, %v1860_v25  ;;  %v2962_v10 = vld [vmem:[%s3234_s15 + $0x90] sm:$0xff] }
 0x3eb   : > { %v2153_v13 = vmul.f32 %v2951_v12, %v1862_v26  ;;  %v2963_v12 = vld [vmem:[%s3234_s15 + $0x98] sm:$0xff] }
 0x3ed   : > { %v3539_v27 = vpop.f32.mrb[40].mxu0 }
 0x3ee   : > { %v3541_v28 = vpop.f32.mrb[41].mxu0  ;;  %v2154_v20 = vmul.f32 %v2952_v19, %v3539_v27  ;;  %v2965_v19 = vld [vmem:[%s3234_s15 + $0xa8] sm:$0xff] }
 0x3ef   : > { %v2155_v22 = vmul.f32 %v2953_v21, %v3541_v28 }
 0x3f1   : > { %v3543_v29 = vpop.f32.mrb[42].mxu0 }
 0x3f2   : > { %v3545_v30 = vpop.f32.mrb[43].mxu0 }
 0x3f5   : > { %v3547_v17 = vpop.f32.mrb[44].mxu0 }
 0x3f6   : > { %v3549_v31 = vpop.f32.mrb[45].mxu0 }
 0x3f9   : > { %v3551_v32 = vpop.f32.mrb[46].mxu0 }
 0x3fa   : > { %v3553_v33 = vpop.f32.mrb[47].mxu0 }
 0x3fd   : > { %v3555_v34 = vpop.f32.mrb[48].mxu0 }
 0x3fe   : > { %v3557_v35 = vpop.f32.mrb[49].mxu0 }
 0x401   : > { %v3559_v36 = vpop.f32.mrb[50].mxu0 }
 0x402   : > { %v3561_v37 = vpop.f32.mrb[51].mxu0 }
 0x405   : > { %v3563_v38 = vpop.f32.mrb[52].mxu0 }
 0x406   : > { %v3565_v39 = vpop.f32.mrb[53].mxu0 }
 0x409   : > { %v3567_v40 = vpop.f32.mrb[54].mxu0 }
 0x40a   : > { %v3569_v41 = vpop.f32.mrb[55].mxu0 }
 0x40d   : > { %v3571_v42 = vpop.f32.mrb[56].mxu0 }
 0x40e   : > { %v3573_v43 = vpop.f32.mrb[57].mxu0 }
 0x411   : > { %v3575_v44 = vpop.f32.mrb[58].mxu0 }
 0x412   : > { %v3577_v45 = vpop.f32.mrb[59].mxu0 }
 0x415   : > { %v3579_v46 = vpop.f32.mrb[60].mxu0 }
 0x416   : > { %v3581_v47 = vpop.f32.mrb[61].mxu0 }
 0x419   : > { %v3583_v48 = vpop.f32.mrb[62].mxu0 }
 0x41a   : > { %v3585_v49 = vpop.f32.mrb[63].mxu0 }
 0x450   : > { %v2051_v54 = vpop.f32.mrb[40].mxu1 }
 0x451   : > { %v2178_v55 = vmul.f32 %v2146_v51, %v2051_v54  ;;  %v2053_v56 = vpop.f32.mrb[41].mxu1  ;;  %v2156_v51 = vmul.f32 %v2954_v50, %v3543_v29  ;;  %v2159_v29 = vmul.f32 %v2957_v58, %v3549_v31  ;;  %v2971_v58 = vld [vmem:[%s3234_s15 + $0xd8] sm:$0xff] }
 0x452   : > { %v2179_v57 = vmul.f32 %v2147_v53, %v2053_v56  ;;  %v2157_v53 = vmul.f32 %v2955_v52, %v3545_v30  ;;  %v2956_v56 = vld [vmem:[%s3234_s15 + $0x60] sm:$0xff] }
 0x453   : > { %2210 = vst [vmem:[%s3592_s20] sm:$0xff] %v2178_v55  ;;  %v2968_v52 = vld [vmem:[%s3234_s15 + $0xc0] sm:$0xff] }
 0x454   : > { %2211 = vst [vmem:[%s3592_s20 + $0x8] sm:$0xff] %v2179_v57  ;;  %v2057_v62 = vpop.f32.mrb[42].mxu1  ;;  %v2158_v57 = vmul.f32 %v2956_v56, %v3547_v17  ;;  %v2970_v56 = vld [vmem:[%s3234_s15 + $0xd0] sm:$0xff] }
 0x455   : > { %v2180_v63 = vmul.f32 %v2148_v59, %v2057_v62  ;;  %v2059_v0 = vpop.f32.mrb[43].mxu1  ;;  %v2958_v62 = vld [vmem:[%s3234_s15 + $0x70] sm:$0xff] }
 0x456   : > { %v2181_v1 = vmul.f32 %v2149_v61, %v2059_v0  ;;  %v2959_v0 = vld [vmem:[%s3234_s15 + $0x78] sm:$0xff] }
 0x457   : > { %2212 = vst [vmem:[%s3592_s20 + $0x10] sm:$0xff] %v2180_v63  ;;  %v2160_v63 = vmul.f32 %v2958_v62, %v3551_v32  ;;  %v2161_v17 = vmul.f32 %v2959_v0, %v3553_v33 }
 0x458   : > { %2213 = vst [vmem:[%s3592_s20 + $0x18] sm:$0xff] %v2181_v1  ;;  %v2063_v6 = vpop.f32.mrb[44].mxu1 }
 0x459   : > { %v2182_v7 = vmul.f32 %v2150_v3, %v2063_v6  ;;  %v2065_v8 = vpop.f32.mrb[45].mxu1  ;;  %v2961_v6 = vld [vmem:[%s3234_s15 + $0x88] sm:$0xff] }
 0x45a   : > { %v2183_v9 = vmul.f32 %v2151_v5, %v2065_v8  ;;  %v2162_v5 = vmul.f32 %v2960_v4, %v3555_v34  ;;  %v2163_v32 = vmul.f32 %v2961_v6, %v3557_v35 }
 0x45b   : > { %2214 = vst [vmem:[%s3592_s20 + $0x20] sm:$0xff] %v2182_v7 }
 0x45c   : > { %2215 = vst [vmem:[%s3592_s20 + $0x28] sm:$0xff] %v2183_v9  ;;  %v2069_v14 = vpop.f32.mrb[46].mxu1 }
 0x45d   : > { %v2184_v15 = vmul.f32 %v2152_v11, %v2069_v14  ;;  %v2071_v16 = vpop.f32.mrb[47].mxu1  ;;  %v2164_v11 = vmul.f32 %v2962_v10, %v3559_v36  ;;  %v2167_v36 = vmul.f32 %v2965_v19, %v3565_v39 }
 0x45e   : > { %v2185_v18 = vmul.f32 %v2153_v13, %v2071_v16  ;;  %v2165_v13 = vmul.f32 %v2963_v12, %v3561_v37  ;;  %v2964_v16 = vld [vmem:[%s3234_s15 + $0xa0] sm:$0xff] }
 0x45f   : > { %2216 = vst [vmem:[%s3592_s20 + $0x30] sm:$0xff] %v2184_v15 }
 0x460   : > { %2217 = vst [vmem:[%s3592_s20 + $0x38] sm:$0xff] %v2185_v18  ;;  %v2166_v18 = vmul.f32 %v2964_v16, %v3563_v38 }
 0x461   : > { %v2075_v23 = vpop.f32.mrb[48].mxu1 }
 0x462   : > { %v2186_v24 = vmul.f32 %v2154_v20, %v2075_v23  ;;  %v2077_v25 = vpop.f32.mrb[49].mxu1  ;;  %v2966_v23 = vld [vmem:[%s3234_s15 + $0xb0] sm:$0xff] }
 0x463   : > { %v2187_v26 = vmul.f32 %v2155_v22, %v2077_v25  ;;  %v2967_v25 = vld [vmem:[%s3234_s15 + $0xb8] sm:$0xff] }
 0x464   : > { %2218 = vst [vmem:[%s3592_s20 + $0x40] sm:$0xff] %v2186_v24  ;;  %v2168_v24 = vmul.f32 %v2966_v23, %v3567_v40  ;;  %v2169_v38 = vmul.f32 %v2967_v25, %v3569_v41 }
 0x465   : > { %2219 = vst [vmem:[%s3592_s20 + $0x48] sm:$0xff] %v2187_v26  ;;  %v2081_v27 = vpop.f32.mrb[50].mxu1 }
 0x466   : > { %v2188_v54 = vmul.f32 %v2156_v51, %v2081_v27  ;;  %v2083_v28 = vpop.f32.mrb[51].mxu1  ;;  %v2969_v27 = vld [vmem:[%s3234_s15 + $0xc8] sm:$0xff] }
 0x467   : > { %v2189_v55 = vmul.f32 %v2157_v53, %v2083_v28  ;;  %v2170_v53 = vmul.f32 %v2968_v52, %v3571_v42  ;;  %v2171_v40 = vmul.f32 %v2969_v27, %v3573_v43 }
 0x468   : > { %2220 = vst [vmem:[%s3592_s20 + $0x50] sm:$0xff] %v2188_v54 }
 0x469   : > { %2221 = vst [vmem:[%s3592_s20 + $0x58] sm:$0xff] %v2189_v55  ;;  %v2087_v30 = vpop.f32.mrb[52].mxu1 }
 0x46a   : > { %v2190_v59 = vmul.f32 %v2158_v57, %v2087_v30  ;;  %v2089_v60 = vpop.f32.mrb[53].mxu1  ;;  %v2172_v57 = vmul.f32 %v2970_v56, %v3575_v44  ;;  %v2973_v44 = vld [vmem:[%s3234_s15 + $0xe8] sm:$0xff] }
 0x46b   : > { %v2191_v61 = vmul.f32 %v2159_v29, %v2089_v60  ;;  %v2173_v29 = vmul.f32 %v2971_v58, %v3577_v45  ;;  %v2972_v60 = vld [vmem:[%s3234_s15 + $0xe0] sm:$0xff]  ;;  %v2175_v62 = vmul.f32 %v2973_v44, %v3581_v47 }
 0x46c   : > { %2222 = vst [vmem:[%s3592_s20 + $0x60] sm:$0xff] %v2190_v59 }
 0x46d   : > { %2223 = vst [vmem:[%s3592_s20 + $0x68] sm:$0xff] %v2191_v61  ;;  %v2093_v1 = vpop.f32.mrb[54].mxu1  ;;  %v2174_v61 = vmul.f32 %v2972_v60, %v3579_v46  ;;  %v2975_v46 = vld [vmem:[%s3234_s15 + $0xf8] sm:$0xff] }
 0x46e   : > { %v2192_v31 = vmul.f32 %v2160_v63, %v2093_v1  ;;  %v2095_v2 = vpop.f32.mrb[55].mxu1  ;;  %v2974_v1 = vld [vmem:[%s3234_s15 + $0xf0] sm:$0xff]  ;;  %s3006_s15 = scalar_lea.vmem %s3684_s22, 4096 }
 0x46f   : > { %v2193_v3 = vmul.f32 %v2161_v17, %v2095_v2  ;;  %v2177_v2 = vmul.f32 %v2975_v46, %v3585_v49  ;;  %p3007_p6 = scmp.ne.s32.totalorder %s3684_s22, %s3006_s15  ;;  %p3014_p10 = scmp.lt.s32.totalorder %s3012_s8, %s3006_s15 }
 0x470   : > { %2224 = vst [vmem:[%s3592_s20 + $0x70] sm:$0xff] %v2192_v31  ;;  %v2176_v31 = vmul.f32 %v2974_v1, %v3583_v48 }
 0x471   : > { %2225 = vst [vmem:[%s3592_s20 + $0x78] sm:$0xff] %v2193_v3  ;;  %v2099_v7 = vpop.f32.mrb[56].mxu1  ;;  %p3008_p12 = pnand %p3007_p6, %p3744_p11  ;;  %p3015_p0 = por %p3014_p10, %p3013_p8 }
 0x472   : > { %v2194_v33 = vmul.f32 %v2162_v5, %v2099_v7  ;;  %v2101_v8 = vpop.f32.mrb[57].mxu1 }
 0x473   : > { %v2195_v9 = vmul.f32 %v2163_v32, %v2101_v8  ;;  %p3009_p13 = pneg %p3008_p12 }
 0x474   : > { %2226 = vst [vmem:[%s3592_s20 + $0x80] sm:$0xff] %v2194_v33 }
 0x475   : > { %2227 = vst [vmem:[%s3592_s20 + $0x88] sm:$0xff] %v2195_v9  ;;  %v2105_v34 = vpop.f32.mrb[58].mxu1  ;;  %p3016_p2 = pnand %p3015_p0, %p3009_p13 }
 0x476   : > { %v2196_v14 = vmul.f32 %v2164_v11, %v2105_v34  ;;  %v2107_v35 = vpop.f32.mrb[59].mxu1 }
 0x477   : > { %v2197_v15 = vmul.f32 %v2165_v13, %v2107_v35 }
 0x478   : > { %2228 = vst [vmem:[%s3592_s20 + $0x90] sm:$0xff] %v2196_v14 }
 0x479   : > { %2229 = vst [vmem:[%s3592_s20 + $0x98] sm:$0xff] %v2197_v15  ;;  %v2111_v37 = vpop.f32.mrb[60].mxu1 }
 0x47a   : > { %v2198_v20 = vmul.f32 %v2166_v18, %v2111_v37  ;;  %v2113_v21 = vpop.f32.mrb[61].mxu1 }
 0x47b   : > { %v2199_v22 = vmul.f32 %v2167_v36, %v2113_v21 }
 0x47c   : > { %2230 = vst [vmem:[%s3592_s20 + $0xa0] sm:$0xff] %v2198_v20 }
 0x47d   : > { %2231 = vst [vmem:[%s3592_s20 + $0xa8] sm:$0xff] %v2199_v22  ;;  %v2117_v26 = vpop.f32.mrb[62].mxu1 }
 0x47e   : > { %v2200_v39 = vmul.f32 %v2168_v24, %v2117_v26  ;;  %v2119_v50 = vpop.f32.mrb[63].mxu1 }
 0x47f   : > { %v2201_v51 = vmul.f32 %v2169_v38, %v2119_v50 }
 0x480   : > { %2232 = vst [vmem:[%s3592_s20 + $0xb0] sm:$0xff] %v2200_v39 }
 0x481   : > { %2233 = vst [vmem:[%s3592_s20 + $0xb8] sm:$0xff] %v2201_v51  ;;  %v2123_v54 = vpop.f32.mrb[64].mxu1 }
 0x482   : > { %v2202_v41 = vmul.f32 %v2170_v53, %v2123_v54  ;;  %v2125_v28 = vpop.f32.mrb[65].mxu1 }
 0x483   : > { %v2203_v55 = vmul.f32 %v2171_v40, %v2125_v28 }
 0x484   : > { %2234 = vst [vmem:[%s3592_s20 + $0xc0] sm:$0xff] %v2202_v41 }
 0x485   : > { %2235 = vst [vmem:[%s3592_s20 + $0xc8] sm:$0xff] %v2203_v55  ;;  %v2129_v42 = vpop.f32.mrb[66].mxu1 }
 0x486   : > { %v2204_v43 = vmul.f32 %v2172_v57, %v2129_v42  ;;  %v2131_v30 = vpop.f32.mrb[67].mxu1 }
 0x487   : > { %v2205_v59 = vmul.f32 %v2173_v29, %v2131_v30 }
 0x488   : > { %2236 = vst [vmem:[%s3592_s20 + $0xd0] sm:$0xff] %v2204_v43 }
 0x489   : > { %2237 = vst [vmem:[%s3592_s20 + $0xd8] sm:$0xff] %v2205_v59  ;;  %v2135_v45 = vpop.f32.mrb[68].mxu1 }
 0x48a   : > { %v2206_v63 = vmul.f32 %v2174_v61, %v2135_v45  ;;  %v2137_v0 = vpop.f32.mrb[69].mxu1 }
 0x48b   : > { %v2207_v17 = vmul.f32 %v2175_v62, %v2137_v0 }
 0x48c   : > { %2238 = vst [vmem:[%s3592_s20 + $0xe0] sm:$0xff] %v2206_v63 }
 0x48d   : > { %2239 = vst [vmem:[%s3592_s20 + $0xe8] sm:$0xff] %v2207_v17  ;;  %v2141_v47 = vpop.f32.mrb[70].mxu1 }
 0x48e   : > { %v2208_v3 = vmul.f32 %v2176_v31, %v2141_v47  ;;  %v2143_v4 = vpop.f32.mrb[71].mxu1 }
 0x48f   : > { %v2209_v48 = vmul.f32 %v2177_v2, %v2143_v4 }
 0x490   : > { %2240 = vst [vmem:[%s3592_s20 + $0xf0] sm:$0xff] %v2208_v3 }
 0x491   : > { %2241 = vst [vmem:[%s3592_s20 + $0xf8] sm:$0xff] %v2209_v48 }
 0x492   : > { %3019 = shalt.err (!%p3016_p2)
}
 0x493   : > { %s3020_s11 = scalar_lea.hbm %s3682_s19, 4096  ;;  %s3024_s20 = scalar_lea.hbm %s3737_s7, 8192 }
 0x494   : > { %p3021_p4 = scmp.ne.s32.totalorder %s3682_s19, %s3020_s11  ;;  %p3025_p9 = scmp.lt.u32.totalorder %s3682_s19, %s3737_s7 }
 0x495   : > { %p3026_p1 = scmp.lt.u32.totalorder %s3024_s20, %s3020_s11  ;;  %p3028_p6 = scmp.lt.u32.totalorder %s3020_s11, %s3682_s19 }
 0x496   : > { %p3022_p5 = pnand %p3021_p4, %p3744_p11 }
 0x497   : > { %p3027_p3 = por %p3026_p1, %p3025_p9 }
 0x498   : > { %p3023_p7 = pneg %p3022_p5 }
 0x499   : > { %p3029_p12 = por %p3028_p6, %p3027_p3 }
 0x49b   : > { %p3030_p13 = pnand %p3029_p12, %p3023_p7 }
 0x49d   : > { %3033 = shalt.err (!%p3030_p13)
}
 0x49e   : > { %s3082_s29 = smov 256   ;;  %s3083_s15 = smov 16  }
 0x49f   : > { %2764 = dma.vmem_to_hbm [thread:$0]  (%p3744_p11), %s3684_s22, 4096, %s3682_s19, %s2243_s28, %s3082_s29, %s3082_s29, %s3083_s15  }
 0x4a0 PF: > { %s2272_s21 = sand.u32 1, %s3060_s24   ;;  %p3745_p8 = scmp.ne.s32.totalorder %s3742_s14, 0 }
 0x4a1   : > { %p3746_p10 = scmp.ge.s32.totalorder %s3072_s27, 2  ;;  %s2273_s9 = scalar_lea.sflag [#allocation4], %s2272_s21 }
 0x4a3   : > { %p2771_p0 = pnand %p3746_p10, %p3745_p8 }
 0x4a5   : > { %3055 = dma.done.wait (!%p2771_p0), %s2273_s9, 4096  }
 0x4a6   : > { %3057 = vsyncadd (!%p2771_p0), %s2273_s9, 4294963200  ;;  %p20_p2 = scmp.ge.s32.totalorder %s3149_s30, 4   ;;  %s3747_s24 = smov %s3064_s25 }
 0x4a7   : > { %s3748_s25 = smov %s3068_s26  ;;  %s3749_s26 = smov %s3161_s10 }
 0x4a8   : > { %s3750_s27 = smov %s3149_s30  ;;  %22 = sbr.rel (!%p20_p2) target bundleno = 5 (0x5), region = 93 }
 0x4af   :  { %2278 = vsyncpa [#allocation3], 1 }
 0x4b0   :  { %2280 = vsyncpa [#allocation3 + $0x1], 1 }
 0x4b1   :  { %2281 = vsyncpa [#allocation4], 1 }
 0x4b2   :  { %2283 = vsyncpa [#allocation4 + $0x1], 1 }

</bundles_post_ra>
